<compile_context>
chip_gen: v5e
topology: v5e:2x2
jax: 0.10.0
libtpu: 0.0.40
codegen_flags: <defaults>
</compile_context>

<pallas_src>
import functools
import math

import jax
import jax.numpy as jnp
from jax.experimental import pallas as pl
from jax.experimental.pallas import tpu as pltpu


# ----------------------------------------------------------------------------
# In-kernel helper: write the 9 masked 3x3 taps of `x` into the im2col scratch
# ----------------------------------------------------------------------------
def _write_taps(patches_ref, x, *, row_w, img_hw, ux, lane_off, c_pad):
    """x: (c_pad, lanes) f32 lane-dense; lanes = n_imgs * img_hw, images adjacent on
    the lane axis.  row_w: row width in x's flat lane domain.  img_hw: per-image flat
    length (power of two).  ux: width-duplication factor already baked into x (1 or 2);
    dx taps shift by ux*dx lanes and the column-validity margin scales by ux.
    Rows of patches_ref are tap-major / channel-minor (matches _im2col_weight)."""
    lanes = x.shape[1]
    col = jax.lax.broadcasted_iota(jnp.int32, (1, lanes), 1)
    col0 = jnp.bitwise_and(col, img_hw - 1)          # flat index within the image
    wpos = jnp.bitwise_and(col, row_w - 1)           # column within the row
    t = 0
    for dh in range(3):
        for dw in range(3):
            dy, dx = dh - 1, dw - 1
            off = dy * row_w + ux * dx               # lane shift for this tap
            s = x if off == 0 else pltpu.roll(x, shift=(-off) % lanes, axis=1)
            conds = []
            if dy == -1:
                conds.append(col0 >= row_w)                  # source row h-1 exists
            elif dy == 1:
                conds.append(col0 < img_hw - row_w)          # source row h+1 exists
            if dx == -1:
                conds.append(wpos >= ux)                     # source col w-1 exists
            elif dx == 1:
                conds.append(wpos <= row_w - 1 - ux)         # source col w+1 exists
            if conds:
                valid = conds[0]
                for c in conds[1:]:
                    valid = jnp.logical_and(valid, c)
                s = jnp.where(valid, s, 0.0)
            patches_ref[t * c_pad:(t + 1) * c_pad, lane_off:lane_off + lanes] = s
            t += 1


# ----------------------------------------------------------------------------
# Fused FusionBlock kernel: both conv+bn+relu branches (ONE matmul) + x2 up + add
# ----------------------------------------------------------------------------
def _fusion_block_kernel(Cout, Cp, H0, W0, H1, Nb,
                         x0_ref, x1_ref, w_ref, sh_ref, o_ref, patches_ref):
    L0 = Nb * H0 * W0                    # branch-0 / output lanes per grid step
    L1 = Nb * H1 * W0                    # branch-1 lanes (width already duplicated)

    # Shared im2col scratch: branch-0 taps at lanes [0, L0), branch-1 at [L0, L0+L1).
    _write_taps(patches_ref, x0_ref[...], row_w=W0, img_hw=H0 * W0,
                ux=1, lane_off=0, c_pad=Cp)
    _write_taps(patches_ref, x1_ref[...], row_w=W0, img_hw=H1 * W0,
                ux=2, lane_off=L0, c_pad=Cp)

    # ONE MXU matmul for both branches (weights stacked along M, BN scale pre-folded).
    acc = jnp.dot(w_ref[...], patches_ref[...], preferred_element_type=jnp.float32)

    y0 = jnp.maximum(acc[0:Cout, 0:L0] + sh_ref[0:Cout], 0.0)
    y1 = jnp.maximum(acc[Cout:2 * Cout, L0:L0 + L1] + sh_ref[Cout:2 * Cout], 0.0)

    # y1 is already width-upsampled; duplicate each (per-image) row to finish the
    # nearest x2 upsample, fused with the 'add' and the single lane-dense store.
    rows = [y1[:, r * W0:(r + 1) * W0] for r in range(Nb * H1)]
    y1_up = jnp.concatenate([rows[r] for r in range(Nb * H1) for _ in (0, 1)], axis=1)

    o_ref[...] = (y0 + y1_up).astype(o_ref.dtype)


# ----------------------------------------------------------------------------
# Parameter / layout preparation (tiny, one-off host-side JAX)
# ----------------------------------------------------------------------------
def _im2col_weight(w_oihw, c_pad, bn_scale):
    """(Cout, Cin, 3, 3) OIHW -> (Cout, 9*c_pad) im2col weight, tap-major/channel-minor,
    zero-padded channels, with the folded-BN scale baked in."""
    Cout, Cin, kh, kw = w_oihw.shape
    w = jnp.transpose(w_oihw, (0, 2, 3, 1))                  # (Cout, 3, 3, Cin)
    if c_pad != Cin:
        w = jnp.concatenate(
            [w, jnp.zeros((Cout, kh, kw, c_pad - Cin), w.dtype)], axis=-1)
    w = w.reshape(Cout, kh * kw * c_pad).astype(jnp.float32)
    return w * bn_scale.reshape(Cout, 1).astype(jnp.float32)


def _to_lane_major(x_nchw, c_pad, width_dup):
    """(N, C, H, W) NCHW -> (c_pad, N*H*(W*width_dup)): channels on sublanes, batched
    flat spatial on lanes, optional nearest width-duplication.  Single fused XLA
    producer pass; at scale the upstream op should emit this layout directly."""
    N, C, H, W = x_nchw.shape
    if width_dup > 1:
        x_nchw = jnp.repeat(x_nchw, width_dup, axis=3)
        W = W * width_dup
    x = jnp.transpose(x_nchw.reshape(N, C, H * W), (1, 0, 2)).reshape(C, N * H * W)
    if c_pad != C:
        x = jnp.pad(x, ((0, c_pad - C), (0, 0)))
    return x


def fold_bn(gamma, beta, mean, var, eps=1e-5):
    scale = gamma / jnp.sqrt(var + eps)
    shift = beta - mean * scale
    return scale, shift


def fusion_block_forward(feats_nchw, params, from_layers, feat_strides,
                         common_stride=4, method='add', images_per_step=2):
    """Fused Pallas forward for the configured FusionBlock.
    feats_nchw: dict key -> (N, Cin, H, W) f32 (PyTorch NCHW).
    params:     dict key -> [(w_oihw, bn_scale, bn_shift)].
    Returns (N, Cout, H0, W0) NCHW."""
    assert method == 'add' and len(from_layers) == 2
    assert int(feat_strides[0]) == int(common_stride)
    assert int(feat_strides[1]) == 2 * int(common_stride)

    k0, k1 = from_layers
    x0, x1 = feats_nchw[k0], feats_nchw[k1]
    N, C0, H0, W0 = x0.shape
    _, C1, H1, W1 = x1.shape
    assert H0 == 2 * H1 and W0 == 2 * W1
    # Power-of-two sizes let the kernel use shift/and lane masks per image.
    assert W0 & (W0 - 1) == 0 and H0 & (H0 - 1) == 0

    w0, sc0, sh0 = params[k0][0]
    w1, sc1, sh1 = params[k1][0]
    Cout = w0.shape[0]
    assert w1.shape[0] == Cout

    Nb = images_per_step if N % images_per_step == 0 else 1

    # Common channel pad (sublane tile) so the shared im2col scratch stays aligned.
    Cp = ((max(C0, C1) + 7) // 8) * 8

    # Merged, BN-scale-folded im2col weights: one MXU matmul for both branches.
    w_merged = jnp.concatenate([_im2col_weight(w0, Cp, sc0),
                                _im2col_weight(w1, Cp, sc1)], axis=0)   # (2*Cout, 9*Cp)
    sh_merged = jnp.concatenate([sh0, sh1]).reshape(2 * Cout, 1).astype(jnp.float32)

    # Lane-major activations; branch 1 pre-duplicated along W (its conv then emits the
    # width-upsampled result directly -- no quadratic upsample operand).
    x0l = _to_lane_major(x0, Cp, 1)          # (Cp, N*H0*W0)
    x1l = _to_lane_major(x1, Cp, 2)          # (Cp, N*H1*W0)

    L0 = Nb * H0 * W0
    L1 = Nb * H1 * W0

    kernel = functools.partial(_fusion_block_kernel, Cout, Cp, H0, W0, H1, Nb)
    out_flat = pl.pallas_call(
        kernel,
        out_shape=jax.ShapeDtypeStruct((Cout, N * H0 * W0), jnp.float32),
        grid=(N // Nb,),
        in_specs=[
            pl.BlockSpec((Cp, L0), lambda g: (0, g)),
            pl.BlockSpec((Cp, L1), lambda g: (0, g)),
            pl.BlockSpec((2 * Cout, 9 * Cp), lambda g: (0, 0)),
            pl.BlockSpec((2 * Cout, 1), lambda g: (0, 0)),
        ],
        out_specs=pl.BlockSpec((Cout, L0), lambda g: (0, g)),
        scratch_shapes=[pltpu.VMEM((9 * Cp, L0 + L1), jnp.float32)],
        compiler_params=pltpu.CompilerParams(
            dimension_semantics=("parallel",)),
    )(x0l, x1l, w_merged, sh_merged)

    return out_flat.reshape(Cout, N, H0, W0).transpose(1, 0, 2, 3)


# ----------------------------------------------------------------------------
# Pure-JAX reference (module semantics, for correctness check)
# ----------------------------------------------------------------------------
def _ref_conv_bn_relu(x_nchw, w_oihw, scale, shift):
    y = jax.lax.conv_general_dilated(
        x_nchw, w_oihw, window_strides=(1, 1), padding='SAME',
        dimension_numbers=('NCHW', 'OIHW', 'NCHW'))
    y = y * scale.reshape(1, -1, 1, 1) + shift.reshape(1, -1, 1, 1)
    return jnp.maximum(y, 0.0)


def fusion_block_reference(feats_nchw, params, from_layers, feat_strides,
                           common_stride=4, method='add'):
    outs = []
    for idx, key in enumerate(from_layers):
        x = feats_nchw[key]
        feat_stride = feat_strides[idx]
        ups_num = int(max(1, math.log2(feat_stride) - math.log2(common_stride)))
        for idx2 in range(ups_num):
            w, scale, shift = params[key][idx2]
            x = _ref_conv_bn_relu(x, w, scale, shift)
            if int(feat_stride) != int(common_stride):
                x = jnp.repeat(jnp.repeat(x, 2, axis=2), 2, axis=3)
        outs.append(x)
    if method == 'add':
        res = outs[0]
        for o in outs[1:]:
            res = res + o
    else:
        res = jnp.concatenate(outs, axis=1)
    return res


# ----------------------------------------------------------------------------
# main
# ----------------------------------------------------------------------------
if __name__ == "__main__":
    key = jax.random.PRNGKey(0)

    method = 'add'
    from_layers = ['c2', 'c3']
    feat_strides = [4, 8]
    in_channels_list = [4, 8]
    out_channels_list = [8, 8]
    common_stride = 4

    N = 4          # 2 images per grid step -> grid=(2,) "parallel" (feeds both v7x TCs)
    base_hw = 64   # feature map at stride s is base_hw // s
    feats = {}
    params = {}
    for idx, layer in enumerate(from_layers):
        cin = in_channels_list[idx]
        cout = out_channels_list[idx]
        s = feat_strides[idx]
        hw = base_hw // s
        key, k_x, k_w, k_g, k_b, k_m, k_v = jax.random.split(key, 7)
        feats[layer] = jax.random.normal(k_x, (N, cin, hw, hw), jnp.float32)
        w_oihw = jax.random.normal(k_w, (cout, cin, 3, 3), jnp.float32) \
            * (1.0 / math.sqrt(cin * 9))
        gamma = 1.0 + 0.1 * jax.random.normal(k_g, (cout,), jnp.float32)
        beta = 0.1 * jax.random.normal(k_b, (cout,), jnp.float32)
        r_mean = 0.1 * jax.random.normal(k_m, (cout,), jnp.float32)
        r_var = jnp.abs(jax.random.normal(k_v, (cout,), jnp.float32)) + 0.5
        scale, shift = fold_bn(gamma, beta, r_mean, r_var)
        params[layer] = [(w_oihw, scale, shift)]   # ups_num == 1 for both branches

    out = fusion_block_forward(feats, params, from_layers, feat_strides,
                               common_stride=common_stride, method=method)
    out = jax.block_until_ready(out)

    ref = fusion_block_reference(feats, params, from_layers, feat_strides,
                                 common_stride=common_stride, method=method)
    ref = jax.block_until_ready(ref)

    assert out.shape == (N, out_channels_list[0],
                         base_hw // common_stride, base_hw // common_stride)
    err = jnp.max(jnp.abs(out - ref))
    assert jnp.allclose(out, ref, rtol=1e-4, atol=1e-4), f"max abs err = {err}"

    print("KERNEL_OK")
</pallas_src>

<mosaic_0001>
module attributes {stable_mosaic.version = 11 : i64} {
  func.func @_fusion_block_kernel(%arg0: i32, %arg1: memref<8x512xf32, #tpu.memory_space<vmem>>, %arg2: memref<8x256xf32, #tpu.memory_space<vmem>>, %arg3: memref<16x72xf32, #tpu.memory_space<vmem>>, %arg4: memref<16x1xf32, #tpu.memory_space<vmem>>, %arg5: memref<8x512xf32, #tpu.memory_space<vmem>>, %arg6: memref<72x768xf32, #tpu.memory_space<vmem>>) attributes {dimension_semantics = [#tpu.dimension_semantics<parallel>], iteration_bounds = array<i64: 2>, scalar_prefetch = 0 : i64, scratch_operands = 1 : i64, tpu.core_type = #tpu.core_type<tc>, window_params = [{transform_indices = @transform_0, window_bounds = array<i64: 8, 512>}, {transform_indices = @transform_1, window_bounds = array<i64: 8, 256>}, {pipeline_mode = #tpu.pipeline_mode<synchronous>, transform_indices = @transform_2, window_bounds = array<i64: 16, 72>}, {pipeline_mode = #tpu.pipeline_mode<synchronous>, transform_indices = @transform_3, window_bounds = array<i64: 16, 1>}, {transform_indices = @transform_4, window_bounds = array<i64: 8, 512>}]} {
    %c0 = arith.constant 0 : index
    %c0_0 = arith.constant 0 : index
    %0 = vector.load %arg1[%c0, %c0_0] : memref<8x512xf32, #tpu.memory_space<vmem>>, vector<8x512xf32>
    %1 = tpu.iota {dimensions = array<i32: 1>} : vector<1x512xi32>
    %c255_i32 = arith.constant 255 : i32
    %2 = vector.broadcast %c255_i32 : i32 to vector<1x512xi32>
    %3 = arith.andi %1, %2 : vector<1x512xi32>
    %c15_i32 = arith.constant 15 : i32
    %4 = vector.broadcast %c15_i32 : i32 to vector<1x512xi32>
    %5 = arith.andi %1, %4 : vector<1x512xi32>
    %c17_i32 = arith.constant 17 : i32
    %6 = tpu.dynamic_rotate %0 by %c17_i32 dim 1 : vector<8x512xf32>, i32 -> vector<8x512xf32>
    %c16_i32 = arith.constant 16 : i32
    %7 = vector.broadcast %c16_i32 : i32 to vector<1x512xi32>
    %8 = arith.cmpi sge, %3, %7 : vector<1x512xi32>
    %c1_i32 = arith.constant 1 : i32
    %9 = vector.broadcast %c1_i32 : i32 to vector<1x512xi32>
    %10 = arith.cmpi sge, %5, %9 : vector<1x512xi32>
    %11 = arith.andi %8, %10 : vector<1x512xi1>
    %cst = arith.constant 0.000000e+00 : f32
    %12 = vector.shape_cast %11 : vector<1x512xi1> to vector<1x512xi1>
    %13 = vector.broadcast %12 : vector<1x512xi1> to vector<8x512xi1>
    %14 = vector.broadcast %cst : f32 to vector<8x512xf32>
    %15 = arith.select %13, %6, %14 : vector<8x512xi1>, vector<8x512xf32>
    %c0_1 = arith.constant 0 : index
    %c0_2 = arith.constant 0 : index
    %16 = vector.load %arg6[%c0_1, %c0_2] : memref<72x768xf32, #tpu.memory_space<vmem>>, vector<8x512xf32>
    tpu.vector_store %arg6[%c0_1, %c0_2], %15 {strides = array<i32>} : memref<72x768xf32, #tpu.memory_space<vmem>>, vector<8x512xf32>,
    %c16_i32_3 = arith.constant 16 : i32
    %17 = tpu.dynamic_rotate %0 by %c16_i32_3 dim 1 : vector<8x512xf32>, i32 -> vector<8x512xf32>
    %c16_i32_4 = arith.constant 16 : i32
    %18 = vector.broadcast %c16_i32_4 : i32 to vector<1x512xi32>
    %19 = arith.cmpi sge, %3, %18 : vector<1x512xi32>
    %cst_5 = arith.constant 0.000000e+00 : f32
    %20 = vector.shape_cast %19 : vector<1x512xi1> to vector<1x512xi1>
    %21 = vector.broadcast %20 : vector<1x512xi1> to vector<8x512xi1>
    %22 = vector.broadcast %cst_5 : f32 to vector<8x512xf32>
    %23 = arith.select %21, %17, %22 : vector<8x512xi1>, vector<8x512xf32>
    %c8 = arith.constant 8 : index
    %c0_6 = arith.constant 0 : index
    %24 = vector.load %arg6[%c8, %c0_6] : memref<72x768xf32, #tpu.memory_space<vmem>>, vector<8x512xf32>
    tpu.vector_store %arg6[%c8, %c0_6], %23 {strides = array<i32>} : memref<72x768xf32, #tpu.memory_space<vmem>>, vector<8x512xf32>,
    %c15_i32_7 = arith.constant 15 : i32
    %25 = tpu.dynamic_rotate %0 by %c15_i32_7 dim 1 : vector<8x512xf32>, i32 -> vector<8x512xf32>
    %c16_i32_8 = arith.constant 16 : i32
    %26 = vector.broadcast %c16_i32_8 : i32 to vector<1x512xi32>
    %27 = arith.cmpi sge, %3, %26 : vector<1x512xi32>
    %c14_i32 = arith.constant 14 : i32
    %28 = vector.broadcast %c14_i32 : i32 to vector<1x512xi32>
    %29 = arith.cmpi sle, %5, %28 : vector<1x512xi32>
    %30 = arith.andi %27, %29 : vector<1x512xi1>
    %cst_9 = arith.constant 0.000000e+00 : f32
    %31 = vector.shape_cast %30 : vector<1x512xi1> to vector<1x512xi1>
    %32 = vector.broadcast %31 : vector<1x512xi1> to vector<8x512xi1>
    %33 = vector.broadcast %cst_9 : f32 to vector<8x512xf32>
    %34 = arith.select %32, %25, %33 : vector<8x512xi1>, vector<8x512xf32>
    %c16 = arith.constant 16 : index
    %c0_10 = arith.constant 0 : index
    %35 = vector.load %arg6[%c16, %c0_10] : memref<72x768xf32, #tpu.memory_space<vmem>>, vector<8x512xf32>
    tpu.vector_store %arg6[%c16, %c0_10], %34 {strides = array<i32>} : memref<72x768xf32, #tpu.memory_space<vmem>>, vector<8x512xf32>,
    %c1_i32_11 = arith.constant 1 : i32
    %36 = tpu.dynamic_rotate %0 by %c1_i32_11 dim 1 : vector<8x512xf32>, i32 -> vector<8x512xf32>
    %c1_i32_12 = arith.constant 1 : i32
    %37 = vector.broadcast %c1_i32_12 : i32 to vector<1x512xi32>
    %38 = arith.cmpi sge, %5, %37 : vector<1x512xi32>
    %cst_13 = arith.constant 0.000000e+00 : f32
    %39 = vector.shape_cast %38 : vector<1x512xi1> to vector<1x512xi1>
    %40 = vector.broadcast %39 : vector<1x512xi1> to vector<8x512xi1>
    %41 = vector.broadcast %cst_13 : f32 to vector<8x512xf32>
    %42 = arith.select %40, %36, %41 : vector<8x512xi1>, vector<8x512xf32>
    %c24 = arith.constant 24 : index
    %c0_14 = arith.constant 0 : index
    %43 = vector.load %arg6[%c24, %c0_14] : memref<72x768xf32, #tpu.memory_space<vmem>>, vector<8x512xf32>
    tpu.vector_store %arg6[%c24, %c0_14], %42 {strides = array<i32>} : memref<72x768xf32, #tpu.memory_space<vmem>>, vector<8x512xf32>,
    %c32 = arith.constant 32 : index
    %c0_15 = arith.constant 0 : index
    %44 = vector.load %arg6[%c32, %c0_15] : memref<72x768xf32, #tpu.memory_space<vmem>>, vector<8x512xf32>
    tpu.vector_store %arg6[%c32, %c0_15], %0 {strides = array<i32>} : memref<72x768xf32, #tpu.memory_space<vmem>>, vector<8x512xf32>,
    %c511_i32 = arith.constant 511 : i32
    %45 = tpu.dynamic_rotate %0 by %c511_i32 dim 1 : vector<8x512xf32>, i32 -> vector<8x512xf32>
    %c14_i32_16 = arith.constant 14 : i32
    %46 = vector.broadcast %c14_i32_16 : i32 to vector<1x512xi32>
    %47 = arith.cmpi sle, %5, %46 : vector<1x512xi32>
    %cst_17 = arith.constant 0.000000e+00 : f32
    %48 = vector.shape_cast %47 : vector<1x512xi1> to vector<1x512xi1>
    %49 = vector.broadcast %48 : vector<1x512xi1> to vector<8x512xi1>
    %50 = vector.broadcast %cst_17 : f32 to vector<8x512xf32>
    %51 = arith.select %49, %45, %50 : vector<8x512xi1>, vector<8x512xf32>
    %c40 = arith.constant 40 : index
    %c0_18 = arith.constant 0 : index
    %52 = vector.load %arg6[%c40, %c0_18] : memref<72x768xf32, #tpu.memory_space<vmem>>, vector<8x512xf32>
    tpu.vector_store %arg6[%c40, %c0_18], %51 {strides = array<i32>} : memref<72x768xf32, #tpu.memory_space<vmem>>, vector<8x512xf32>,
    %c497_i32 = arith.constant 497 : i32
    %53 = tpu.dynamic_rotate %0 by %c497_i32 dim 1 : vector<8x512xf32>, i32 -> vector<8x512xf32>
    %c240_i32 = arith.constant 240 : i32
    %54 = vector.broadcast %c240_i32 : i32 to vector<1x512xi32>
    %55 = arith.cmpi slt, %3, %54 : vector<1x512xi32>
    %c1_i32_19 = arith.constant 1 : i32
    %56 = vector.broadcast %c1_i32_19 : i32 to vector<1x512xi32>
    %57 = arith.cmpi sge, %5, %56 : vector<1x512xi32>
    %58 = arith.andi %55, %57 : vector<1x512xi1>
    %cst_20 = arith.constant 0.000000e+00 : f32
    %59 = vector.shape_cast %58 : vector<1x512xi1> to vector<1x512xi1>
    %60 = vector.broadcast %59 : vector<1x512xi1> to vector<8x512xi1>
    %61 = vector.broadcast %cst_20 : f32 to vector<8x512xf32>
    %62 = arith.select %60, %53, %61 : vector<8x512xi1>, vector<8x512xf32>
    %c48 = arith.constant 48 : index
    %c0_21 = arith.constant 0 : index
    %63 = vector.load %arg6[%c48, %c0_21] : memref<72x768xf32, #tpu.memory_space<vmem>>, vector<8x512xf32>
    tpu.vector_store %arg6[%c48, %c0_21], %62 {strides = array<i32>} : memref<72x768xf32, #tpu.memory_space<vmem>>, vector<8x512xf32>,
    %c496_i32 = arith.constant 496 : i32
    %64 = tpu.dynamic_rotate %0 by %c496_i32 dim 1 : vector<8x512xf32>, i32 -> vector<8x512xf32>
    %c240_i32_22 = arith.constant 240 : i32
    %65 = vector.broadcast %c240_i32_22 : i32 to vector<1x512xi32>
    %66 = arith.cmpi slt, %3, %65 : vector<1x512xi32>
    %cst_23 = arith.constant 0.000000e+00 : f32
    %67 = vector.shape_cast %66 : vector<1x512xi1> to vector<1x512xi1>
    %68 = vector.broadcast %67 : vector<1x512xi1> to vector<8x512xi1>
    %69 = vector.broadcast %cst_23 : f32 to vector<8x512xf32>
    %70 = arith.select %68, %64, %69 : vector<8x512xi1>, vector<8x512xf32>
    %c56 = arith.constant 56 : index
    %c0_24 = arith.constant 0 : index
    %71 = vector.load %arg6[%c56, %c0_24] : memref<72x768xf32, #tpu.memory_space<vmem>>, vector<8x512xf32>
    tpu.vector_store %arg6[%c56, %c0_24], %70 {strides = array<i32>} : memref<72x768xf32, #tpu.memory_space<vmem>>, vector<8x512xf32>,
    %c495_i32 = arith.constant 495 : i32
    %72 = tpu.dynamic_rotate %0 by %c495_i32 dim 1 : vector<8x512xf32>, i32 -> vector<8x512xf32>
    %c240_i32_25 = arith.constant 240 : i32
    %73 = vector.broadcast %c240_i32_25 : i32 to vector<1x512xi32>
    %74 = arith.cmpi slt, %3, %73 : vector<1x512xi32>
    %c14_i32_26 = arith.constant 14 : i32
    %75 = vector.broadcast %c14_i32_26 : i32 to vector<1x512xi32>
    %76 = arith.cmpi sle, %5, %75 : vector<1x512xi32>
    %77 = arith.andi %74, %76 : vector<1x512xi1>
    %cst_27 = arith.constant 0.000000e+00 : f32
    %78 = vector.shape_cast %77 : vector<1x512xi1> to vector<1x512xi1>
    %79 = vector.broadcast %78 : vector<1x512xi1> to vector<8x512xi1>
    %80 = vector.broadcast %cst_27 : f32 to vector<8x512xf32>
    %81 = arith.select %79, %72, %80 : vector<8x512xi1>, vector<8x512xf32>
    %c64 = arith.constant 64 : index
    %c0_28 = arith.constant 0 : index
    %82 = vector.load %arg6[%c64, %c0_28] : memref<72x768xf32, #tpu.memory_space<vmem>>, vector<8x512xf32>
    tpu.vector_store %arg6[%c64, %c0_28], %81 {strides = array<i32>} : memref<72x768xf32, #tpu.memory_space<vmem>>, vector<8x512xf32>,
    %c0_29 = arith.constant 0 : index
    %c0_30 = arith.constant 0 : index
    %83 = vector.load %arg2[%c0_29, %c0_30] : memref<8x256xf32, #tpu.memory_space<vmem>>, vector<8x256xf32>
    %84 = tpu.iota {dimensions = array<i32: 1>} : vector<1x256xi32>
    %c127_i32 = arith.constant 127 : i32
    %85 = vector.broadcast %c127_i32 : i32 to vector<1x256xi32>
    %86 = arith.andi %84, %85 : vector<1x256xi32>
    %c15_i32_31 = arith.constant 15 : i32
    %87 = vector.broadcast %c15_i32_31 : i32 to vector<1x256xi32>
    %88 = arith.andi %84, %87 : vector<1x256xi32>
    %c18_i32 = arith.constant 18 : i32
    %89 = tpu.dynamic_rotate %83 by %c18_i32 dim 1 : vector<8x256xf32>, i32 -> vector<8x256xf32>
    %c16_i32_32 = arith.constant 16 : i32
    %90 = vector.broadcast %c16_i32_32 : i32 to vector<1x256xi32>
    %91 = arith.cmpi sge, %86, %90 : vector<1x256xi32>
    %c2_i32 = arith.constant 2 : i32
    %92 = vector.broadcast %c2_i32 : i32 to vector<1x256xi32>
    %93 = arith.cmpi sge, %88, %92 : vector<1x256xi32>
    %94 = arith.andi %91, %93 : vector<1x256xi1>
    %cst_33 = arith.constant 0.000000e+00 : f32
    %95 = vector.shape_cast %94 : vector<1x256xi1> to vector<1x256xi1>
    %96 = vector.broadcast %95 : vector<1x256xi1> to vector<8x256xi1>
    %97 = vector.broadcast %cst_33 : f32 to vector<8x256xf32>
    %98 = arith.select %96, %89, %97 : vector<8x256xi1>, vector<8x256xf32>
    %c0_34 = arith.constant 0 : index
    %c512 = arith.constant 512 : index
    %99 = vector.load %arg6[%c0_34, %c512] : memref<72x768xf32, #tpu.memory_space<vmem>>, vector<8x256xf32>
    tpu.vector_store %arg6[%c0_34, %c512], %98 {strides = array<i32>} : memref<72x768xf32, #tpu.memory_space<vmem>>, vector<8x256xf32>,
    %c16_i32_35 = arith.constant 16 : i32
    %100 = tpu.dynamic_rotate %83 by %c16_i32_35 dim 1 : vector<8x256xf32>, i32 -> vector<8x256xf32>
    %c16_i32_36 = arith.constant 16 : i32
    %101 = vector.broadcast %c16_i32_36 : i32 to vector<1x256xi32>
    %102 = arith.cmpi sge, %86, %101 : vector<1x256xi32>
    %cst_37 = arith.constant 0.000000e+00 : f32
    %103 = vector.shape_cast %102 : vector<1x256xi1> to vector<1x256xi1>
    %104 = vector.broadcast %103 : vector<1x256xi1> to vector<8x256xi1>
    %105 = vector.broadcast %cst_37 : f32 to vector<8x256xf32>
    %106 = arith.select %104, %100, %105 : vector<8x256xi1>, vector<8x256xf32>
    %c8_38 = arith.constant 8 : index
    %c512_39 = arith.constant 512 : index
    %107 = vector.load %arg6[%c8_38, %c512_39] : memref<72x768xf32, #tpu.memory_space<vmem>>, vector<8x256xf32>
    tpu.vector_store %arg6[%c8_38, %c512_39], %106 {strides = array<i32>} : memref<72x768xf32, #tpu.memory_space<vmem>>, vector<8x256xf32>,
    %c14_i32_40 = arith.constant 14 : i32
    %108 = tpu.dynamic_rotate %83 by %c14_i32_40 dim 1 : vector<8x256xf32>, i32 -> vector<8x256xf32>
    %c16_i32_41 = arith.constant 16 : i32
    %109 = vector.broadcast %c16_i32_41 : i32 to vector<1x256xi32>
    %110 = arith.cmpi sge, %86, %109 : vector<1x256xi32>
    %c13_i32 = arith.constant 13 : i32
    %111 = vector.broadcast %c13_i32 : i32 to vector<1x256xi32>
    %112 = arith.cmpi sle, %88, %111 : vector<1x256xi32>
    %113 = arith.andi %110, %112 : vector<1x256xi1>
    %cst_42 = arith.constant 0.000000e+00 : f32
    %114 = vector.shape_cast %113 : vector<1x256xi1> to vector<1x256xi1>
    %115 = vector.broadcast %114 : vector<1x256xi1> to vector<8x256xi1>
    %116 = vector.broadcast %cst_42 : f32 to vector<8x256xf32>
    %117 = arith.select %115, %108, %116 : vector<8x256xi1>, vector<8x256xf32>
    %c16_43 = arith.constant 16 : index
    %c512_44 = arith.constant 512 : index
    %118 = vector.load %arg6[%c16_43, %c512_44] : memref<72x768xf32, #tpu.memory_space<vmem>>, vector<8x256xf32>
    tpu.vector_store %arg6[%c16_43, %c512_44], %117 {strides = array<i32>} : memref<72x768xf32, #tpu.memory_space<vmem>>, vector<8x256xf32>,
    %c2_i32_45 = arith.constant 2 : i32
    %119 = tpu.dynamic_rotate %83 by %c2_i32_45 dim 1 : vector<8x256xf32>, i32 -> vector<8x256xf32>
    %c2_i32_46 = arith.constant 2 : i32
    %120 = vector.broadcast %c2_i32_46 : i32 to vector<1x256xi32>
    %121 = arith.cmpi sge, %88, %120 : vector<1x256xi32>
    %cst_47 = arith.constant 0.000000e+00 : f32
    %122 = vector.shape_cast %121 : vector<1x256xi1> to vector<1x256xi1>
    %123 = vector.broadcast %122 : vector<1x256xi1> to vector<8x256xi1>
    %124 = vector.broadcast %cst_47 : f32 to vector<8x256xf32>
    %125 = arith.select %123, %119, %124 : vector<8x256xi1>, vector<8x256xf32>
    %c24_48 = arith.constant 24 : index
    %c512_49 = arith.constant 512 : index
    %126 = vector.load %arg6[%c24_48, %c512_49] : memref<72x768xf32, #tpu.memory_space<vmem>>, vector<8x256xf32>
    tpu.vector_store %arg6[%c24_48, %c512_49], %125 {strides = array<i32>} : memref<72x768xf32, #tpu.memory_space<vmem>>, vector<8x256xf32>,
    %c32_50 = arith.constant 32 : index
    %c512_51 = arith.constant 512 : index
    %127 = vector.load %arg6[%c32_50, %c512_51] : memref<72x768xf32, #tpu.memory_space<vmem>>, vector<8x256xf32>
    tpu.vector_store %arg6[%c32_50, %c512_51], %83 {strides = array<i32>} : memref<72x768xf32, #tpu.memory_space<vmem>>, vector<8x256xf32>,
    %c254_i32 = arith.constant 254 : i32
    %128 = tpu.dynamic_rotate %83 by %c254_i32 dim 1 : vector<8x256xf32>, i32 -> vector<8x256xf32>
    %c13_i32_52 = arith.constant 13 : i32
    %129 = vector.broadcast %c13_i32_52 : i32 to vector<1x256xi32>
    %130 = arith.cmpi sle, %88, %129 : vector<1x256xi32>
    %cst_53 = arith.constant 0.000000e+00 : f32
    %131 = vector.shape_cast %130 : vector<1x256xi1> to vector<1x256xi1>
    %132 = vector.broadcast %131 : vector<1x256xi1> to vector<8x256xi1>
    %133 = vector.broadcast %cst_53 : f32 to vector<8x256xf32>
    %134 = arith.select %132, %128, %133 : vector<8x256xi1>, vector<8x256xf32>
    %c40_54 = arith.constant 40 : index
    %c512_55 = arith.constant 512 : index
    %135 = vector.load %arg6[%c40_54, %c512_55] : memref<72x768xf32, #tpu.memory_space<vmem>>, vector<8x256xf32>
    tpu.vector_store %arg6[%c40_54, %c512_55], %134 {strides = array<i32>} : memref<72x768xf32, #tpu.memory_space<vmem>>, vector<8x256xf32>,
    %c242_i32 = arith.constant 242 : i32
    %136 = tpu.dynamic_rotate %83 by %c242_i32 dim 1 : vector<8x256xf32>, i32 -> vector<8x256xf32>
    %c112_i32 = arith.constant 112 : i32
    %137 = vector.broadcast %c112_i32 : i32 to vector<1x256xi32>
    %138 = arith.cmpi slt, %86, %137 : vector<1x256xi32>
    %c2_i32_56 = arith.constant 2 : i32
    %139 = vector.broadcast %c2_i32_56 : i32 to vector<1x256xi32>
    %140 = arith.cmpi sge, %88, %139 : vector<1x256xi32>
    %141 = arith.andi %138, %140 : vector<1x256xi1>
    %cst_57 = arith.constant 0.000000e+00 : f32
    %142 = vector.shape_cast %141 : vector<1x256xi1> to vector<1x256xi1>
    %143 = vector.broadcast %142 : vector<1x256xi1> to vector<8x256xi1>
    %144 = vector.broadcast %cst_57 : f32 to vector<8x256xf32>
    %145 = arith.select %143, %136, %144 : vector<8x256xi1>, vector<8x256xf32>
    %c48_58 = arith.constant 48 : index
    %c512_59 = arith.constant 512 : index
    %146 = vector.load %arg6[%c48_58, %c512_59] : memref<72x768xf32, #tpu.memory_space<vmem>>, vector<8x256xf32>
    tpu.vector_store %arg6[%c48_58, %c512_59], %145 {strides = array<i32>} : memref<72x768xf32, #tpu.memory_space<vmem>>, vector<8x256xf32>,
    %c240_i32_60 = arith.constant 240 : i32
    %147 = tpu.dynamic_rotate %83 by %c240_i32_60 dim 1 : vector<8x256xf32>, i32 -> vector<8x256xf32>
    %c112_i32_61 = arith.constant 112 : i32
    %148 = vector.broadcast %c112_i32_61 : i32 to vector<1x256xi32>
    %149 = arith.cmpi slt, %86, %148 : vector<1x256xi32>
    %cst_62 = arith.constant 0.000000e+00 : f32
    %150 = vector.shape_cast %149 : vector<1x256xi1> to vector<1x256xi1>
    %151 = vector.broadcast %150 : vector<1x256xi1> to vector<8x256xi1>
    %152 = vector.broadcast %cst_62 : f32 to vector<8x256xf32>
    %153 = arith.select %151, %147, %152 : vector<8x256xi1>, vector<8x256xf32>
    %c56_63 = arith.constant 56 : index
    %c512_64 = arith.constant 512 : index
    %154 = vector.load %arg6[%c56_63, %c512_64] : memref<72x768xf32, #tpu.memory_space<vmem>>, vector<8x256xf32>
    tpu.vector_store %arg6[%c56_63, %c512_64], %153 {strides = array<i32>} : memref<72x768xf32, #tpu.memory_space<vmem>>, vector<8x256xf32>,
    %c238_i32 = arith.constant 238 : i32
    %155 = tpu.dynamic_rotate %83 by %c238_i32 dim 1 : vector<8x256xf32>, i32 -> vector<8x256xf32>
    %c112_i32_65 = arith.constant 112 : i32
    %156 = vector.broadcast %c112_i32_65 : i32 to vector<1x256xi32>
    %157 = arith.cmpi slt, %86, %156 : vector<1x256xi32>
    %c13_i32_66 = arith.constant 13 : i32
    %158 = vector.broadcast %c13_i32_66 : i32 to vector<1x256xi32>
    %159 = arith.cmpi sle, %88, %158 : vector<1x256xi32>
    %160 = arith.andi %157, %159 : vector<1x256xi1>
    %cst_67 = arith.constant 0.000000e+00 : f32
    %161 = vector.shape_cast %160 : vector<1x256xi1> to vector<1x256xi1>
    %162 = vector.broadcast %161 : vector<1x256xi1> to vector<8x256xi1>
    %163 = vector.broadcast %cst_67 : f32 to vector<8x256xf32>
    %164 = arith.select %162, %155, %163 : vector<8x256xi1>, vector<8x256xf32>
    %c64_68 = arith.constant 64 : index
    %c512_69 = arith.constant 512 : index
    %165 = vector.load %arg6[%c64_68, %c512_69] : memref<72x768xf32, #tpu.memory_space<vmem>>, vector<8x256xf32>
    tpu.vector_store %arg6[%c64_68, %c512_69], %164 {strides = array<i32>} : memref<72x768xf32, #tpu.memory_space<vmem>>, vector<8x256xf32>,
    %c0_70 = arith.constant 0 : index
    %c0_71 = arith.constant 0 : index
    %166 = vector.load %arg3[%c0_70, %c0_71] : memref<16x72xf32, #tpu.memory_space<vmem>>, vector<16x72xf32>
    %c0_72 = arith.constant 0 : index
    %c0_73 = arith.constant 0 : index
    %167 = vector.load %arg6[%c0_72, %c0_73] : memref<72x768xf32, #tpu.memory_space<vmem>>, vector<72x768xf32>
    %cst_74 = arith.constant dense<0.000000e+00> : vector<16x768xf32>
    %168 = tpu.matmul %166, %167, %cst_74 {dimension_numbers = #tpu.dot_dimension_numbers<[1], [0], [0], [1], [0, 0, 1, 1], [], []>} : vector<16x72xf32>, vector<72x768xf32>, vector<16x768xf32> -> vector<16x768xf32>
    %169 = vector.extract_strided_slice %168 {offsets = [0, 0], sizes = [8, 512], strides = [1, 1]} : vector<16x768xf32> to vector<8x512xf32>
    %c0_75 = arith.constant 0 : index
    %c0_76 = arith.constant 0 : index
    %170 = vector.load %arg4[%c0_75, %c0_76] : memref<16x1xf32, #tpu.memory_space<vmem>>, vector<8x1xf32>
    %171 = vector.broadcast %170 : vector<8x1xf32> to vector<8x512xf32>
    %172 = arith.addf %169, %171 : vector<8x512xf32>
    %cst_77 = arith.constant 0.000000e+00 : f32
    %173 = vector.broadcast %cst_77 : f32 to vector<8x512xf32>
    %174 = arith.maximumf %172, %173 : vector<8x512xf32>
    %175 = vector.extract_strided_slice %168 {offsets = [8, 512], sizes = [8, 256], strides = [1, 1]} : vector<16x768xf32> to vector<8x256xf32>
    %c8_78 = arith.constant 8 : index
    %c0_79 = arith.constant 0 : index
    %176 = vector.load %arg4[%c8_78, %c0_79] : memref<16x1xf32, #tpu.memory_space<vmem>>, vector<8x1xf32>
    %177 = vector.broadcast %176 : vector<8x1xf32> to vector<8x256xf32>
    %178 = arith.addf %175, %177 : vector<8x256xf32>
    %cst_80 = arith.constant 0.000000e+00 : f32
    %179 = vector.broadcast %cst_80 : f32 to vector<8x256xf32>
    %180 = arith.maximumf %178, %179 : vector<8x256xf32>
    %181 = vector.extract_strided_slice %180 {offsets = [0, 0], sizes = [8, 16], strides = [1, 1]} : vector<8x256xf32> to vector<8x16xf32>
    %182 = vector.extract_strided_slice %180 {offsets = [0, 16], sizes = [8, 16], strides = [1, 1]} : vector<8x256xf32> to vector<8x16xf32>
    %183 = vector.extract_strided_slice %180 {offsets = [0, 32], sizes = [8, 16], strides = [1, 1]} : vector<8x256xf32> to vector<8x16xf32>
    %184 = vector.extract_strided_slice %180 {offsets = [0, 48], sizes = [8, 16], strides = [1, 1]} : vector<8x256xf32> to vector<8x16xf32>
    %185 = vector.extract_strided_slice %180 {offsets = [0, 64], sizes = [8, 16], strides = [1, 1]} : vector<8x256xf32> to vector<8x16xf32>
    %186 = vector.extract_strided_slice %180 {offsets = [0, 80], sizes = [8, 16], strides = [1, 1]} : vector<8x256xf32> to vector<8x16xf32>
    %187 = vector.extract_strided_slice %180 {offsets = [0, 96], sizes = [8, 16], strides = [1, 1]} : vector<8x256xf32> to vector<8x16xf32>
    %188 = vector.extract_strided_slice %180 {offsets = [0, 112], sizes = [8, 16], strides = [1, 1]} : vector<8x256xf32> to vector<8x16xf32>
    %189 = vector.extract_strided_slice %180 {offsets = [0, 128], sizes = [8, 16], strides = [1, 1]} : vector<8x256xf32> to vector<8x16xf32>
    %190 = vector.extract_strided_slice %180 {offsets = [0, 144], sizes = [8, 16], strides = [1, 1]} : vector<8x256xf32> to vector<8x16xf32>
    %191 = vector.extract_strided_slice %180 {offsets = [0, 160], sizes = [8, 16], strides = [1, 1]} : vector<8x256xf32> to vector<8x16xf32>
    %192 = vector.extract_strided_slice %180 {offsets = [0, 176], sizes = [8, 16], strides = [1, 1]} : vector<8x256xf32> to vector<8x16xf32>
    %193 = vector.extract_strided_slice %180 {offsets = [0, 192], sizes = [8, 16], strides = [1, 1]} : vector<8x256xf32> to vector<8x16xf32>
    %194 = vector.extract_strided_slice %180 {offsets = [0, 208], sizes = [8, 16], strides = [1, 1]} : vector<8x256xf32> to vector<8x16xf32>
    %195 = vector.extract_strided_slice %180 {offsets = [0, 224], sizes = [8, 16], strides = [1, 1]} : vector<8x256xf32> to vector<8x16xf32>
    %196 = vector.extract_strided_slice %180 {offsets = [0, 240], sizes = [8, 16], strides = [1, 1]} : vector<8x256xf32> to vector<8x16xf32>
    %197 = tpu.concatenate %181, %181, %182, %182, %183, %183, %184, %184, %185, %185, %186, %186, %187, %187, %188, %188 in 1 : vector<8x16xf32>, vector<8x16xf32>, vector<8x16xf32>, vector<8x16xf32>, vector<8x16xf32>, vector<8x16xf32>, vector<8x16xf32>, vector<8x16xf32>, vector<8x16xf32>, vector<8x16xf32>, vector<8x16xf32>, vector<8x16xf32>, vector<8x16xf32>, vector<8x16xf32>, vector<8x16xf32>, vector<8x16xf32> -> vector<8x256xf32>
    %198 = tpu.concatenate %189, %189, %190, %190, %191, %191, %192, %192, %193, %193, %194, %194, %195, %195, %196, %196 in 1 : vector<8x16xf32>, vector<8x16xf32>, vector<8x16xf32>, vector<8x16xf32>, vector<8x16xf32>, vector<8x16xf32>, vector<8x16xf32>, vector<8x16xf32>, vector<8x16xf32>, vector<8x16xf32>, vector<8x16xf32>, vector<8x16xf32>, vector<8x16xf32>, vector<8x16xf32>, vector<8x16xf32>, vector<8x16xf32> -> vector<8x256xf32>
    %199 = tpu.concatenate %197, %198 in 1 : vector<8x256xf32>, vector<8x256xf32> -> vector<8x512xf32>
    %200 = arith.addf %174, %199 : vector<8x512xf32>
    %c0_81 = arith.constant 0 : index
    %c0_82 = arith.constant 0 : index
    %201 = vector.load %arg5[%c0_81, %c0_82] : memref<8x512xf32, #tpu.memory_space<vmem>>, vector<8x512xf32>
    tpu.vector_store %arg5[%c0_81, %c0_82], %200 {strides = array<i32>} : memref<8x512xf32, #tpu.memory_space<vmem>>, vector<8x512xf32>,
    return
  }
  func.func @transform_0(%arg0: i32) -> (i32, i32) {
    %c0_i32 = arith.constant 0 : i32
    %c0_i32_0 = arith.constant 0 : i32
    return %c0_i32, %arg0 : i32, i32
  }
  func.func @transform_1(%arg0: i32) -> (i32, i32) {
    %c0_i32 = arith.constant 0 : i32
    %c0_i32_0 = arith.constant 0 : i32
    return %c0_i32, %arg0 : i32, i32
  }
  func.func @transform_2(%arg0: i32) -> (i32, i32) {
    %c0_i32 = arith.constant 0 : i32
    %c0_i32_0 = arith.constant 0 : i32
    %c0_i32_1 = arith.constant 0 : i32
    return %c0_i32, %c0_i32_0 : i32, i32
  }
  func.func @transform_3(%arg0: i32) -> (i32, i32) {
    %c0_i32 = arith.constant 0 : i32
    %c0_i32_0 = arith.constant 0 : i32
    %c0_i32_1 = arith.constant 0 : i32
    return %c0_i32, %c0_i32_0 : i32, i32
  }
  func.func @transform_4(%arg0: i32) -> (i32, i32) {
    %c0_i32 = arith.constant 0 : i32
    %c0_i32_0 = arith.constant 0 : i32
    return %c0_i32, %arg0 : i32, i32
  }
}

</mosaic_0001>

<bundles_post_ra>
// kernel: tpu_custom_call.1
= control target key start
LH: loop header
LB: loop body
LE: loop exit
PB: predicated region body
PF: predicated region fallthrough
CT: control target
= control target key end

     0   :  { %s2309_s0 = inlined_call_operand.hbm [shape: f32[8,1024], index: 0, kind: input, shape index: {}]   ;;  %s2310_s1 = inlined_call_operand.hbm [shape: f32[8,512], index: 1, kind: input, shape index: {}]   ;;  %s2311_s2 = inlined_call_operand.vmem [shape: f32[16,72], index: 2, kind: input, shape index: {}]   ;;  %s2312_s3 = inlined_call_operand.vmem [shape: f32[16,1], index: 3, kind: input, shape index: {}]   ;;  %s2313_s4 = inlined_call_operand.hbm [shape: f32[8,1024], index: 4, kind: output, shape index: {}]  }
   0x1   :  { %2331 = sst [smem:[#allocation12_spill]] %s2309_s0 }
   0x2   :  { %9 = vsyncpa [#allocation4], 0 }
   0x3   :  { %11 = vsyncpa [#allocation4 + $0x1], 0 }
   0x4   :  { %12 = vsyncpa [#allocation7], 0 }
   0x5   :  { %14 = vsyncpa [#allocation7 + $0x1], 0 }
   0x6   :  { %15 = vsyncpa [#allocation5], 0 }
   0x7   :  { %17 = vsyncpa [#allocation5 + $0x1], 0  ;;  %s1444_s15 = smov 0   ;;  %s1446_s16 = smov 0  }
   0x8   :  { %s1448_s17 = smov 0   ;;  %s1450_s18 = smov 0  }
   0x9 LB: > { %s1465_s19 = sadd.s32 4294967295, %s1397_s18   ;;  %s1100_s20 = sadd.s32 4294967294, %s1397_s18   ;;  %s1397_s18 = sphi %s1450_s18, %s2414_s18   ;;  %s1393_s17 = sphi %s1448_s17, %s2413_s17   ;;  %s1389_s16 = sphi %s1446_s16, %s2412_s16   ;;  %s1385_s15 = sphi %s1444_s15, %s2411_s15  }
   0xa   : > { %s1469_s21 = sadd.s32 1, %s1397_s18   ;;  %s30_s22 = sadd.s32 1, %s1393_s17 }
   0xb   : > { %s27_s23 = ssub.s32 %s1397_s18, %s1469_s21  ;;  %p37_p0 = scmp.ne.s32.totalorder %s1393_s17, %s1389_s16 }
   0xc   : > { %p28_p1 = scmp.eq.s32.totalorder %s27_s23, 0  ;;  %p38_p2 = scmp.eq.s32.totalorder %s1397_s18, 0 }
   0xd   : > { %p43_p3 = scmp.ne.s32.totalorder %s1389_s16, %s1385_s15  ;;  %p44_p4 = scmp.eq.s32.totalorder %s1465_s19, 0 }
   0xe   : > { %s1481_s24 = scalar_select %p28_p1, %s1393_s17, %s30_s22  }
   0xf   : > { %p1483_p5 = por %p38_p2, %p37_p0  ;;  %p1487_p6 = por %p44_p4, %p43_p3 }
  0x10   : > { %p135_p7 = scmp.eq.s32.totalorder %s1465_s19, 1  ;;  %p141_p8 = scmp.eq.s32.totalorder %s1100_s20, 1 }
  0x11   : > { %p1212_p10 = scmp.lt.s32.totalorder %s1397_s18, 2  ;;  %s1503_s29 = sand.u32 1, %s1393_s17  }
  0x12   : > { %p1494_p11 = por %p135_p7, %p37_p0  ;;  %p1498_p12 = por %p141_p8, %p43_p3 }
  0x13   : > { %s1130_s30 = sshll.u32 %s1397_s18, 5  ;;  %s1103_s5 = sshll.u32 %s1503_s29, 5 }
  0x14   : > { %s2336_s0 = sld [smem:[#allocation12_spill]]  ;;  %s171_s10 = scalar_lea.vmem [#allocation3], %s1103_s5 }
  0x15   : > { %s180_s11 = sshll.u32 %s171_s10, 4  ;;  %p1512_p13 = pnand %p1212_p10, %p1483_p5  ;;  %s181_s11 = int_to_ptr.vmem [resolvable:$true] %s180_s11 }
  0x16   : > { %p1109_p0 = scmp.ge.s32.totalorder %s1397_s18, 1  ;;  %p205_p1 = scmp.lt.s32.totalorder %s1397_s18, 3 }
  0x17   : > { %s1106_s13 = sshll.u32 %s1503_s29, 4  ;;  %s168_s14 = scalar_lea.sflag [#allocation4], %s1503_s29 }
  0x18   : > { %p1271_p3 = pneg %p1512_p13 }
  0x1a   : > { %s176_s8 = scalar_lea.hbm %s2336_s0, %s1130_s30  ;;  %s1274_s30 = scalar_lea.hbm %s2336_s0, 64 }
  0x1b   : > { %s178_s9 = sshll.u32 %s176_s8, 4  ;;  %s179_s9 = int_to_ptr.hbm [resolvable:$true] %s178_s9 }
  0x1c   : > { %s1267_s20 = sshra.s32 %s179_s9, 4  ;;  %s1268_s20 = int_to_ptr.hbm [resolvable:$true] %s1267_s20 }
  0x1d   : > { %s1269_s22 = scalar_lea.hbm %s1268_s20, 32  ;;  %p1275_p5 = scmp.lt.s32.totalorder %s1268_s20, %s2336_s0 }
  0x1e   : > { %p1270_p2 = scmp.ne.s32.totalorder %s1268_s20, %s1269_s22  ;;  %p1276_p8 = scmp.lt.s32.totalorder %s1274_s30, %s1269_s22 }
  0x20   : > { %p1272_p4 = pnand %p1271_p3, %p1270_p2  ;;  %p1277_p10 = por %p1276_p8, %p1275_p5 }
  0x22   : > { %p1273_p7 = pneg %p1272_p4 }
  0x24   : > { %p1278_p9 = pnand %p1277_p10, %p1273_p7 }
  0x26   : > { %1281 = shalt.err (!%p1278_p9)
}
  0x27   : > { %1204 = dma.hbm_to_vmem [thread:$0]  (!%p1512_p13), %s179_s9, 512, %s181_s11, %s168_s14  }
  0x28   : > { %p1537_p2 = pnand %p1109_p0, %p205_p1  ;;  %s1131_s8 = sshll.u32 %s1397_s18, 4 }
  0x29   : > { %s191_s10 = scalar_lea.vmem [#allocation6], %s1106_s13  ;;  %s196_s25 = scalar_lea.hbm %s2310_s1, %s1131_s8 }
  0x2a   : > { %s200_s20 = sshll.u32 %s191_s10, 4  ;;  %s198_s30 = sshll.u32 %s196_s25, 4  ;;  %s201_s20 = int_to_ptr.vmem [resolvable:$true] %s200_s20  ;;  %s199_s30 = int_to_ptr.hbm [resolvable:$true] %s198_s30 }
  0x2b   : > { %s188_s5 = scalar_lea.sflag [#allocation7], %s1503_s29  ;;  %s1297_s6 = sshra.s32 %s199_s30, 4  ;;  %s1298_s6 = int_to_ptr.hbm [resolvable:$true] %s1297_s6 }
  0x2c   : > { %s1299_s9 = scalar_lea.hbm %s1298_s6, 16  ;;  %s1304_s13 = scalar_lea.hbm %s2310_s1, 32 }
  0x2d   : > { %p1300_p9 = scmp.ne.s32.totalorder %s1298_s6, %s1299_s9  ;;  %p1305_p4 = scmp.lt.s32.totalorder %s1298_s6, %s2310_s1 }
  0x2e   : > { %p1306_p7 = scmp.lt.s32.totalorder %s1304_s13, %s1299_s9 }
  0x2f   : > { %p1302_p0 = pnand %p1300_p9, %p1271_p3 }
  0x30   : > { %p1307_p5 = por %p1306_p7, %p1305_p4 }
  0x31   : > { %p1303_p1 = pneg %p1302_p0 }
  0x33   : > { %p1308_p8 = pnand %p1307_p5, %p1303_p1 }
  0x35   : > { %1311 = shalt.err (!%p1308_p8)
}
  0x36   : > { %1207 = dma.hbm_to_vmem [thread:$0]  (!%p1512_p13), %s199_s30, 256, %s201_s20, %s188_s5  }
  0x37   : > { %209 = sbr.rel (%p1537_p2) target bundleno = 587 (0x24b), region = 36  ;;  %s1560_s29 = sand.u32 (!%p1537_p2), 1, %s1389_s16  }
  0x38   : > { %s1110_s8 = sshll.u32 (!%p1537_p2), %s1560_s29, 5  ;;  %s212_s0 = scalar_lea.sflag (!%p1537_p2), [#allocation4], %s1560_s29 }
  0x39   : > { %s215_s22 = scalar_lea.vmem (!%p1537_p2), [#allocation3], %s1110_s8 }
  0x3c   : > { %1372 = dma.done.wait (%p1487_p6), %s212_s0, 512  }
  0x3d   : > { %1374 = vsyncadd (%p1487_p6), %s212_s0, 4294966784  ;;  %s1111_s12 = sshll.u32 %s1560_s29, 4  ;;  %s222_s7 = scalar_lea.sflag [#allocation7], %s1560_s29 }
  0x3e   : > { %s1572_s20 = scalar_lea.vmem [#allocation6], %s1111_s12 }
  0x3f   : > { %1376 = dma.done.wait (%p1487_p6), %s222_s7, 256  }
  0x40   : > { %1378 = vsyncadd (%p1487_p6), %s222_s7, 4294967040  ;;  %v1578_v0 = vld [vmem:[%s215_s22 + $0x18] sm:$0xff]  ;;  %v1580_v1 = vld [vmem:[%s215_s22 + $0x10] sm:$0xff]  ;;  %s1399_s23 = smov 111   ;;  %s1400_s25 = smov 112   ;;  %v263_v7 = vlaneseq }
  0x41   : > { %v1582_v2 = vld [vmem:[%s215_s22] sm:$0xff]  ;;  %517 = vrot.lane.b32.xlu1 %v1578_v0, %s1399_s23  ;;  %486 = vrot.lane.b32.xlu2 %v1580_v1, %s1400_s25  ;;  %s1401_s26 = smov 113   ;;  %s1402_s30 = smov 127   ;;  %v1608_v3 = vld [vmem:[%s215_s22 + $0x8] sm:$0xff] }
  0x42   : > { %511 = vrot.lane.b32.xlu0 %v1582_v2, %s1399_s23  ;;  %s1403_s5 = smov 1   ;;  %s1404_s6 = smov 15   ;;  %v1635_v4 = vld [vmem:[%s1572_s20] sm:$0xff]  ;;  %v1638_v5 = vld [vmem:[%s1572_s20 + $0x8] sm:$0xff]  ;;  %v1661_v9 = vand.u32 127, %v263_v7 }
  0x43   : > { %s1405_s9 = smov 16   ;;  %s1406_s11 = smov 17  }
  0x44   : > { %s1407_s14 = smov 110   ;;  %s1408_s13 = smov 114   ;;  %v267_v10 = vadd.s32 384, %v1661_v9  ;;  %vm2319_vm2 = vcmp.lt.s32.totalorder %v1661_v9, 111  ;;  %v266_v18 = vadd.s32 256, %v1661_v9  ;;  %vm2317_vm5 = vcmp.lt.s32.totalorder %v1661_v9, 112 }
  0x45   : > { %s1409_s10 = smov 2   ;;  %s1410_s0 = smov 126   ;;  %vm2316_vm7 = vcmp.lt.s32.totalorder %v1661_v9, 113  ;;  %vm2315_vm10 = vcmp.lt.s32.totalorder %v1661_v9, 127  ;;  %vm2323_vm11 = vcmp.lt.s32.totalorder %v1661_v9, 1  ;;  %vm2314_vm13 = vcmp.lt.s32.totalorder %v1661_v9, 15 }
  0x46   : > { %s1411_s22 = smov 14   ;;  %s1412_s12 = smov 18   ;;  %v271_v12 = vand.u32 255, %v267_v10  ;;  %v275_v13 = vand.u32 15, %v267_v10  ;;  %v274_v21 = vand.u32 15, %v266_v18  ;;  %v270_v45 = vand.u32 255, %v266_v18 }
  0x47   : > { %vm2320_vm15 = vcmp.lt.s32.totalorder %v1661_v9, 16  ;;  %v1816_v58 = vadd.s32 128, %v1661_v9  ;;  %v1826_v61 = vand.u32 15, %v1661_v9  ;;  %v1887_v18 = vld [vmem:[%s2311_s2 + $0x8] sm:$0xff] }
  0x48   : > { %vm1669_vm0 = vcmp.le.s32.totalorder %v275_v13, 14  ;;  %vm1673_vm1 = vcmp.lt.s32.totalorder %v271_v12, 240  ;;  %vm1704_vm4 = vcmp.le.s32.totalorder %v274_v21, 14  ;;  %vm1724_vm6 = vcmp.ge.s32.totalorder %v275_v13, 1 }
  0x49   : > { %488 = vrot.lane.b32.xlu2 %v1578_v0, %s1400_s25  ;;  %482 = vrot.lane.b32.xlu1 %v1582_v2, %s1400_s25  ;;  %vm527_vm3 = vmand %vm1673_vm1, %vm1669_vm0  ;;  %vm1729_vm8 = vcmp.ge.s32.totalorder %v274_v21, 1  ;;  %vm1785_vm12 = vcmp.ge.s32.totalorder %v270_v45, 16  ;;  %v1413_v21 = vmov 0  }
  0x4a   : > { %515 = vrot.lane.b32.xlu0 %v1580_v1, %s1399_s23  ;;  %vm465_vm9 = vmand %vm1673_vm1, %vm1724_vm6 }
  0x4b   : > { %vm365_vm14 = vmand %vm1785_vm12, %vm1704_vm4  ;;  %1266 = vset.pattern.permute.xlu0 %v1413_v21 }
  0x51   : > { %451 = vrot.lane.b32.xlu2 %v1578_v0, %s1401_s26  ;;  %449 = vrot.lane.b32.xlu1 %v1580_v1, %s1401_s26 }
  0x52   : > { %445 = vrot.lane.b32.xlu0 %v1582_v2, %s1401_s26 }
  0x59   : > { %422 = vrot.lane.b32.xlu2 %v1578_v0, %s1402_s30  ;;  %420 = vrot.lane.b32.xlu1 %v1580_v1, %s1402_s30 }
  0x5a   : > { %416 = vrot.lane.b32.xlu0 %v1582_v2, %s1402_s30 }
  0x61   : > { %389 = vrot.lane.b32.xlu2 %v1578_v0, %s1403_s5  ;;  %387 = vrot.lane.b32.xlu1 %v1580_v1, %s1403_s5 }
  0x62   : > { %385 = vrot.lane.b32.xlu0 %v1608_v3, %s1403_s5 }
  0x69   : > { %352 = vrot.lane.b32.xlu2 %v1578_v0, %s1404_s6  ;;  %350 = vrot.lane.b32.xlu1 %v1580_v1, %s1404_s6 }
  0x6a   : > { %348 = vrot.lane.b32.xlu0 %v1608_v3, %s1404_s6 }
  0x71   : > { %323 = vrot.lane.b32.xlu2 %v1578_v0, %s1405_s9  ;;  %321 = vrot.lane.b32.xlu1 %v1580_v1, %s1405_s9 }
  0x72   : > { %319 = vrot.lane.b32.xlu0 %v1608_v3, %s1405_s9 }
  0x79   : > { %282 = vrot.lane.b32.xlu2 %v1578_v0, %s1406_s11  ;;  %280 = vrot.lane.b32.xlu1 %v1580_v1, %s1406_s11 }
  0x7a   : > { %278 = vrot.lane.b32.xlu0 %v1608_v3, %s1406_s11 }
  0x81   : > { %653 = vrot.lane.b32.xlu2 %v1635_v4, %s1400_s25  ;;  %669 = vrot.lane.b32.xlu1 %v1638_v5, %s1407_s14 }
  0x82   : > { %667 = vrot.lane.b32.xlu0 %v1635_v4, %s1407_s14  ;;  %s1414_s14 = smov 64  }
  0x89   : > { %636 = vrot.lane.b32.xlu2 %v1638_v5, %s1408_s13  ;;  %634 = vrot.lane.b32.xlu1 %v1635_v4, %s1408_s13  ;;  %s1415_s13 = smov 96  }
  0x8a   : > { %655 = vrot.lane.b32.xlu0 %v1638_v5, %s1400_s25 }
  0x91   : > { %602 = vrot.lane.b32.xlu2 %v1635_v4, %s1409_s10  ;;  %621 = vrot.lane.b32.xlu1 %v1638_v5, %s1410_s0 }
  0x92   : > { %619 = vrot.lane.b32.xlu0 %v1635_v4, %s1410_s0  ;;  %s1417_s0 = smov 48  }
  0x99   : > { %585 = vrot.lane.b32.xlu2 %v1638_v5, %s1411_s22  ;;  %583 = vrot.lane.b32.xlu1 %v1635_v4, %s1411_s22  ;;  %s1418_s22 = smov 32  }
  0x9a   : > { %604 = vrot.lane.b32.xlu0 %v1638_v5, %s1409_s10  ;;  %s1416_s10 = smov 80  }
  0x9b   : > { %v1654_v6 = vpop.permute.xlu2 %486 }
  0xa1   : > { %548 = vrot.lane.b32.xlu2 %v1635_v4, %s1412_s12  ;;  %571 = vrot.lane.b32.xlu1 %v1638_v5, %s1405_s9 }
  0xa2   : > { %569 = vrot.lane.b32.xlu0 %v1635_v4, %s1405_s9 }
  0xa3   : > { %v489_v8 = vpop.permute.xlu2 %488 }
  0xa4   : > { %v491_v28 = vsel %vm2317_vm5, %v1654_v6, %v489_v8 }
  0xa9   : > { %484 = vrot.lane.b32.xlu2 %v1608_v3, %s1400_s25  ;;  %513 = vrot.lane.b32.xlu1 %v1608_v3, %s1399_s23  ;;  %s991_s23 = scalar_lea.sflag [#allocation5], %s1560_s29 }
  0xaa   : > { %550 = vrot.lane.b32.xlu0 %v1638_v5, %s1412_s12 }
  0xab   : > { %v452_v11 = vpop.permute.xlu2 %451 }
  0xb1   : > { %383 = vrot.lane.b32.xlu2 %v1582_v2, %s1403_s5  ;;  %418 = vrot.lane.b32.xlu1 %v1608_v3, %s1402_s30 }
  0xb2   : > { %447 = vrot.lane.b32.xlu0 %v1608_v3, %s1401_s26 }
  0xb3   : > { %v518_v16 = vpop.permute.xlu1 %517  ;;  %v423_v17 = vpop.permute.xlu2 %422 }
  0xb4   : > { %v1689_v19 = vpop.permute.xlu0 %511 }
  0xb5   : > { %v523_v20 = vsel %vm2319_vm2, %v518_v16, %v1689_v19 }
  0xb6   : > { %1154 = vmatpush.msk.msra.mxu3 %vm527_vm3, %v523_v20  ;;  %vm2318_vm3 = vcmask 588800   ;;  %v893_v20 = vld [vmem:[%s2312_s3 + $0x8] sm:$0xff] }
  0xb9   : > { %276 = vrot.lane.b32.xlu2 %v1582_v2, %s1406_s11  ;;  %317 = vrot.lane.b32.xlu1 %v1582_v2, %s1405_s9  ;;  %s1347_s11 = scalar_lea.hbm %s2313_s4, 64 }
  0xba   : > { %346 = vrot.lane.b32.xlu0 %v1582_v2, %s1404_s6 }
  0xbb   : > { %v1700_v22 = vpop.permute.xlu2 %389  ;;  %v1702_v23 = vpop.permute.xlu1 %482 }
  0xbc   : > { %v1709_v25 = vpop.permute.xlu0 %515  ;;  %v494_v26 = vsel %vm2317_vm5, %v489_v8, %v1702_v23  ;;  %v1845_v8 = vld [vmem:[%s2311_s2] sm:$0xff] }
  0xbd   : > { %v520_v27 = vsel %vm2319_vm2, %v1709_v25, %v518_v16  ;;  %1155 = vmatpush.msk.msra.mxu3 %vm1673_vm1, %v494_v26  ;;  %vm299_vm1 = vmand %vm1785_vm12, %vm1729_vm8  ;;  %vm587_vm2 = vcmp.lt.s32.totalorder %v1661_v9, 14 }
  0xbe   : > { %1147 = vmatpush.msk.msra.mxu2 %vm1704_vm4, %v520_v27 }
  0xc0   : > { %799 = vmatpush.msra.mxu2 %v491_v28 }
  0xc2   : > { %896 = vperm.xlu0 %1266, %v893_v20  }
  0xc3   : > { %v1733_v31 = vpop.permute.xlu2 %352  ;;  %v1735_v32 = vpop.permute.xlu1 %449 }
  0xc4   : > { %v1741_v33 = vpop.permute.xlu0 %445  ;;  %v454_v34 = vsel %vm2316_vm7, %v1735_v32, %v452_v11 }
  0xc5   : > { %v457_v35 = vsel %vm2316_vm7, %v452_v11, %v1741_v33  ;;  %1148 = vmatpush.msk.msra.mxu2 %vm1729_vm8, %v454_v34 }
  0xc6   : > { %1156 = vmatpush.msk.msra.mxu3 %vm465_vm9, %v457_v35 }
  0xcb   : > { %v1752_v36 = vpop.permute.xlu2 %323  ;;  %v1754_v37 = vpop.permute.xlu1 %420 }
  0xcc   : > { %v1756_v38 = vpop.permute.xlu0 %416  ;;  %v425_v39 = vsel %vm2315_vm10, %v1754_v37, %v423_v17 }
  0xcd   : > { %v428_v40 = vsel %vm2315_vm10, %v423_v17, %v1756_v38  ;;  %1149 = vmatpush.msk.msra.mxu2 %vm1704_vm4, %v425_v39  ;;  %vm2321_vm4 = vcmp.le.s32.totalorder %v1826_v61, 13 }
  0xce   : > { %1157 = vmatpush.msk.msra.mxu3 %vm1669_vm0, %v428_v40  ;;  %v879_v40 = vld [vmem:[%s2312_s3] sm:$0xff] }
  0xcf   : > { %802 = vmatpush.msra.mxu2 %v1580_v1  ;;  %v547_v1 = vand.u32 127, %v1816_v58  ;;  %882 = vperm.xlu0 %1266, %v879_v40  }
  0xd0   : > { %824 = vmatpush.msra.mxu3 %v1578_v0  ;;  %v1834_v0 = vand.u32 15, %v1816_v58 }
  0xd1   : > { %vm1853_vm9 = vcmp.lt.s32.totalorder %v547_v1, 112 }
  0xd3   : > { %v1771_v41 = vpop.permute.xlu2 %282  ;;  %v388_v42 = vpop.permute.xlu1 %387 }
  0xd4   : > { %v1773_v43 = vpop.permute.xlu0 %385  ;;  %v392_v44 = vsel %vm2323_vm11, %v388_v42, %v1700_v22 }
  0xd5   : > { %v393_v46 = vsel %vm2323_vm11, %v1773_v43, %v388_v42  ;;  %1158 = vmatpush.msk.msra.mxu3 %vm1724_vm6, %v392_v44 }
  0xd6   : > { %1150 = vmatpush.msk.msra.mxu2 %vm1729_vm8, %v393_v46  ;;  %vm2322_vm8 = vcmp.le.s32.totalorder %v1834_v0, 13 }
  0xdb   : > { %v654_v48 = vpop.permute.xlu2 %653  ;;  %v351_v49 = vpop.permute.xlu1 %350 }
  0xdc   : > { %v1794_v50 = vpop.permute.xlu0 %348  ;;  %v355_v51 = vsel %vm2314_vm13, %v351_v49, %v1733_v31 }
  0xdd   : > { %v356_v52 = vsel %vm2314_vm13, %v1794_v50, %v351_v49  ;;  %1159 = vmatpush.msk.msra.mxu3 %vm1669_vm0, %v355_v51  ;;  %vm284_vm0 = vcmp.lt.s32.totalorder %v1661_v9, 17  ;;  %vm2324_vm13 = vcmp.ge.s32.totalorder %v1834_v0, 2 }
  0xde   : > { %1151 = vmatpush.msk.msra.mxu2 %vm365_vm14, %v356_v52  ;;  %vm1870_vm14 = vmand %vm1853_vm9, %vm2322_vm8 }
  0xdf   : > { %vm1925_vm7 = vmand %vm1853_vm9, %vm2324_vm13 }
  0xe3   : > { %v637_v53 = vpop.permute.xlu2 %636  ;;  %v322_v54 = vpop.permute.xlu1 %321 }
  0xe4   : > { %v1805_v55 = vpop.permute.xlu0 %319  ;;  %v326_v56 = vsel %vm2320_vm15, %v322_v54, %v1752_v36 }
  0xe5   : > { %v327_v57 = vsel %vm2320_vm15, %v1805_v55, %v322_v54  ;;  %827 = vmatpush.msra.mxu3 %v326_v56 }
  0xe6   : > { %1152 = vmatpush.msk.msra.mxu2 %vm1785_vm12, %v327_v57  ;;  %vm1862_vm12 = vmand %vm2317_vm5, %vm2321_vm4 }
  0xeb   : > { %v1819_v59 = vpop.permute.xlu2 %602  ;;  %v281_v60 = vpop.permute.xlu1 %280 }
  0xec   : > { %v1828_v62 = vpop.permute.xlu0 %278  ;;  %v285_v63 = vsel %vm284_vm0, %v281_v60, %v1771_v41 }
  0xed   : > { %v286_v7 = vsel %vm284_vm0, %v1828_v62, %v281_v60  ;;  %1160 = vmatpush.msk.msra.mxu3 %vm1724_vm6, %v285_v63  ;;  %vm671_vm6 = vcmp.lt.s32.totalorder %v1661_v9, 110 }
  0xee   : > { %1153 = vmatpush.msk.msra.mxu2 %vm299_vm1, %v286_v7  ;;  %1119 = vmatmul.msk.f32.vlgmr.msra.gmra.mxu3 %vm2318_vm3, %v1845_v8  ;;  %vm2328_vm1 = vcmp.ge.s32.totalorder %v1826_v61, 2  ;;  %v269_v7 = vand.u32 255, %v1816_v58 }
  0xef   : > { %1117 = vmatmul.msk.f32.vlgmr.msra.gmra.mxu2 %vm2318_vm3, %v1845_v8  ;;  %vm1905_vm10 = vmand %vm2317_vm5, %vm2328_vm1 }
  0xf3   : > { %v586_v12 = vpop.permute.xlu2 %585  ;;  %v670_v13 = vpop.permute.xlu1 %669 }
  0xf4   : > { %v668_v15 = vpop.permute.xlu0 %667 }
  0xf5   : > { %v1874_v16 = vsel %vm671_vm6, %v668_v15, %v670_v13  ;;  %v1876_v17 = vsel %vm671_vm6, %v670_v13, %v668_v15  ;;  %vm638_vm6 = vcmp.lt.s32.totalorder %v1661_v9, 114 }
  0xf6   : > { %1177 = vmatpush.msk.msrb.mxu2 %vm1862_vm12, %v1874_v16  ;;  %1186 = vmatpush.msk.msrb.mxu3 %vm1870_vm14, %v1876_v17 }
  0xf7   : > { %1118 = vmatmul.msk.f32.gmra.mxu2 %vm2318_vm3, %v1887_v18  ;;  %1120 = vmatmul.msk.f32.gmra.mxu3 %vm2318_vm3, %v1887_v18  ;;  %vm606_vm3 = vcmp.lt.s32.totalorder %v1661_v9, 2 }
  0xfb   : > { %v1899_v24 = vpop.permute.xlu2 %548  ;;  %v635_v26 = vpop.permute.xlu1 %634 }
  0xfc   : > { %v656_v27 = vpop.permute.xlu0 %655  ;;  %v1917_v34 = vsel %vm638_vm6, %v635_v26, %v637_v53  ;;  %v1919_v35 = vsel %vm638_vm6, %v637_v53, %v635_v26  ;;  %vm623_vm6 = vcmp.lt.s32.totalorder %v1661_v9, 126  ;;  %v2363_v53 = vmov 0 }
  0xfd   : > { %v1911_v29 = vsel %vm2317_vm5, %v654_v48, %v656_v27  ;;  %v1915_v30 = vsel %vm2317_vm5, %v656_v27, %v654_v48 }
  0xfe   : > { %1178 = vmatpush.msk.msrb.mxu2 %vm2317_vm5, %v1911_v29  ;;  %1187 = vmatpush.msk.msrb.mxu3 %vm1853_vm9, %v1915_v30  ;;  %vm2327_vm5 = vcmp.ge.s32.totalorder %v1661_v9, 16 }
  0xff   : > { %vm1970_vm15 = vmand %vm2327_vm5, %vm2321_vm4 }
 0x100   : > { %1179 = vmatpush.msk.msrb.mxu2 %vm1905_vm10, %v1917_v34  ;;  %1188 = vmatpush.msk.msrb.mxu3 %vm1925_vm7, %v1919_v35  ;;  %v2364_v53 = vsel %vm1970_vm15, 4294967295, %v2363_v53 }
 0x103   : > { %v485_v42 = vpop.permute.xlu2 %484  ;;  %v622_v44 = vpop.permute.xlu1 %621 }
 0x104   : > { %v620_v45 = vpop.permute.xlu0 %619 }
 0x105   : > { %v1945_v46 = vsel %vm623_vm6, %v620_v45, %v622_v44  ;;  %v1947_v47 = vsel %vm623_vm6, %v622_v44, %v620_v45  ;;  %vm1960_vm6 = vcmp.ge.s32.totalorder %v547_v1, 16  ;;  %v2365_v1 = vmov 0 }
 0x106   : > { %1180 = vmatpush.msk.msrb.mxu2 %vm2321_vm4, %v1945_v46  ;;  %1189 = vmatpush.msk.msrb.mxu3 %vm2322_vm8, %v1947_v47  ;;  %vm1994_vm4 = vmand %vm1960_vm6, %vm2322_vm8  ;;  %vm2329_vm8 = vcmp.le.s32.totalorder %v1834_v0, 14 }
 0x107   : > { %v2366_v1 = vsel %vm1994_vm4, 4294967295, %v2365_v1 }
 0x108   : > { %1181 = vmatpush.msrb.mxu2 %v1635_v4  ;;  %1190 = vmatpush.msrb.mxu3 %v1638_v5 }
 0x10b   : > { %v1964_v49 = vpop.permute.xlu2 %383  ;;  %v584_v51 = vpop.permute.xlu1 %583 }
 0x10c   : > { %v605_v52 = vpop.permute.xlu0 %604  ;;  %v1978_v54 = vsel %vm2323_vm11, %v1964_v49, %v1773_v43  ;;  %v1986_v60 = vsel %vm587_vm2, %v586_v12, %v584_v51  ;;  %v1988_v63 = vsel %vm587_vm2, %v584_v51, %v586_v12  ;;  %vm2367_vm2 = vcmp.lt.s32.totalorder %v1661_v9, 16 }
 0x10d   : > { %v1981_v56 = vsel %vm606_vm3, %v605_v52, %v1819_v59  ;;  %v1984_v57 = vsel %vm606_vm3, %v1819_v59, %v605_v52  ;;  %vm2368_vm3 = vmmov %vm2367_vm2  ;;  %vm2032_vm11 = vcmp.lt.s32.totalorder %v269_v7, 240 }
 0x10e   : > { %1182 = vmatpush.msk.msrb.mxu2 %vm2328_vm1, %v1981_v56  ;;  %1191 = vmatpush.msk.msrb.mxu3 %vm2324_vm13, %v1984_v57  ;;  %vm552_vm13 = vcmp.lt.s32.totalorder %v1661_v9, 18 }
 0x110   : > { %1183 = vmatpush.msk.msrb.mxu2 %vm1970_vm15, %v1986_v60  ;;  %1192 = vmatpush.msk.msrb.mxu3 %vm1994_vm4, %v1988_v63  ;;  %vm2373_vm4 = vcmp.ge.s32.totalorder %v1834_v0, 2 }
 0x111   : > { %vm2054_vm15 = vmand %vm1960_vm6, %vm2373_vm4 }
 0x113   : > { %v277_v43 = vpop.permute.xlu2 %276  ;;  %v572_v59 = vpop.permute.xlu1 %571 }
 0x114   : > { %v570_v12 = vpop.permute.xlu0 %569  ;;  %v288_v13 = vsel %vm284_vm0, %v1771_v41, %v277_v43  ;;  %v287_v15 = vsel %vm284_vm0, %v277_v43, %v1828_v62  ;;  %vm2040_vm0 = vmand %vm2327_vm5, %vm2328_vm1 }
 0x115   : > { %v2019_v20 = vsel %vm2367_vm2, %v572_v59, %v570_v12  ;;  %v2023_v21 = vsel %vm2368_vm3, %v570_v12, %v572_v59  ;;  %vm359_vm2 = vcmp.le.s32.totalorder %v1826_v61, 14  ;;  %vm525_vm3 = vmand %vm2032_vm11, %vm2329_vm8  ;;  %vm2384_vm8 = vcmp.lt.s32.totalorder %v1661_v9, 127 }
 0x116   : > { %1184 = vmatpush.msk.msrb.mxu2 %vm2327_vm5, %v2019_v20  ;;  %1193 = vmatpush.msk.msrb.mxu3 %vm1960_vm6, %v2023_v21  ;;  %vm2376_vm5 = vcmp.lt.s32.totalorder %v1661_v9, 111 }
 0x117   : > { %vm2377_vm1 = vmmov %vm2376_vm5 }
 0x11b   : > { %v514_v62 = vpop.permute.xlu1 %513 }
 0x11c   : > { %v551_v27 = vpop.permute.xlu0 %550  ;;  %v522_v40 = vsel %vm2376_vm5, %v1689_v19, %v514_v62  ;;  %v521_v44 = vsel %vm2377_vm1, %v514_v62, %v1709_v25  ;;  %vm2378_vm5 = vcmask 588800   ;;  %vm2380_vm1 = vcmp.lt.s32.totalorder %v1661_v9, 112 }
 0x11d   : > { %1133 = vmatpush.msk.msra.mxu0 %vm359_vm2, %v522_v40  ;;  %1140 = vmatpush.msk.msra.mxu1 %vm525_vm3, %v521_v44  ;;  %v2067_v45 = vsel %vm552_vm13, %v551_v27, %v1899_v24  ;;  %v2070_v51 = vsel %vm552_vm13, %v1899_v24, %v551_v27  ;;  %vm2379_vm4 = vmmov %vm2378_vm5  ;;  %v493_v19 = vsel %vm2380_vm1, %v1702_v23, %v485_v42  ;;  %vm2330_vm3 = vcmp.ge.s32.totalorder %v1834_v0, 1 }
 0x11e   : > { %1185 = vmatpush.msk.msrb.mxu2 %vm2040_vm0, %v2067_v45  ;;  %1194 = vmatpush.msk.msrb.mxu3 %vm2054_vm15, %v2070_v51  ;;  %vm2381_vm13 = vmmov %vm2380_vm1  ;;  %v268_v23 = vand.u32 255, %v1661_v9  ;;  %vm2382_vm1 = vcmp.lt.s32.totalorder %v1661_v9, 113 }
 0x11f   : > { %1122 = vmatmul.msk.f32.vlgmr.msrb.gmra.mxu2 %vm2378_vm5, %v1887_v18  ;;  %1124 = vmatmul.msk.f32.vlgmr.msrb.gmra.mxu3 %vm2379_vm4, %v1887_v18  ;;  %v492_v25 = vsel %vm2381_vm13, %v485_v42, %v1654_v6  ;;  %vm293_vm5 = vcmp.ge.s32.totalorder %v1826_v61, 1  ;;  %vm463_vm4 = vmand %vm2032_vm11, %vm2330_vm3 }
 0x120   : > { %755 = vmatpush.msra.mxu0 %v493_v19  ;;  %1141 = vmatpush.msk.msra.mxu1 %vm2032_vm11, %v492_v25  ;;  %vm2383_vm13 = vmmov %vm2382_vm1  ;;  %vm2115_vm3 = vcmp.ge.s32.totalorder %v268_v23, 16 }
 0x121   : > { %vm2385_vm11 = vmmov %vm2384_vm8 }
 0x123   : > { %v419_v24 = vpop.permute.xlu1 %418 }
 0x124   : > { %v448_v52 = vpop.permute.xlu0 %447  ;;  %v427_v43 = vsel %vm2384_vm8, %v1756_v38, %v419_v24  ;;  %v426_v59 = vsel %vm2385_vm11, %v419_v24, %v1754_v37  ;;  %vm2389_vm8 = vcmp.lt.s32.totalorder %v1661_v9, 1  ;;  %vm2391_vm11 = vcmp.lt.s32.totalorder %v1661_v9, 15 }
 0x125   : > { %v456_v6 = vsel %vm2382_vm1, %v1741_v33, %v448_v52  ;;  %v455_v42 = vsel %vm2383_vm13, %v448_v52, %v1735_v32  ;;  %vm2386_vm1 = vcmp.le.s32.totalorder %v1834_v0, 14  ;;  %v395_v33 = vsel %vm2389_vm8, %v1700_v22, %v1964_v49 }
 0x126   : > { %1134 = vmatpush.msk.msra.mxu0 %vm293_vm5, %v456_v6  ;;  %1142 = vmatpush.msk.msra.mxu1 %vm463_vm4, %v455_v42  ;;  %vm363_vm4 = vmand %vm2115_vm3, %vm359_vm2  ;;  %vm2390_vm13 = vcmp.ge.s32.totalorder %v1834_v0, 1  ;;  %vm2394_vm8 = vcmp.lt.s32.totalorder %v1661_v9, 16 }
 0x128   : > { %1135 = vmatpush.msk.msra.mxu0 %vm359_vm2, %v427_v43  ;;  %1143 = vmatpush.msk.msra.mxu1 %vm2386_vm1, %v426_v59  ;;  %vm2392_vm1 = vmmov %vm2391_vm11  ;;  %vm2393_vm2 = vcmp.le.s32.totalorder %v1834_v0, 14 }
 0x12a   : > { %758 = vmatpush.msra.mxu0 %v1582_v2  ;;  %780 = vmatpush.msra.mxu1 %v1608_v3 }
 0x12b   : > { %v318_v37 = vpop.permute.xlu1 %317 }
 0x12c   : > { %1136 = vmatpush.msk.msra.mxu0 %vm293_vm5, %v395_v33  ;;  %1144 = vmatpush.msk.msra.mxu1 %vm2390_vm13, %v1978_v54  ;;  %v347_v2 = vpop.permute.xlu0 %346  ;;  %v329_v38 = vsel %vm2394_vm8, %v1752_v36, %v318_v37  ;;  %vm2395_vm13 = vmmov %vm2394_vm8  ;;  %vm2406_vm8 = vnez %v2364_v53 }
 0x12d   : > { %v358_v3 = vsel %vm2391_vm11, %v1733_v31, %v347_v2  ;;  %v357_v22 = vsel %vm2392_vm1, %v347_v2, %v1794_v50  ;;  %v328_v49 = vsel %vm2395_vm13, %v318_v37, %v1805_v55  ;;  %vm297_vm11 = vmand %vm2115_vm3, %vm293_vm5  ;;  %vm2397_vm1 = vcmask 588800  }
 0x12e   : > { %1137 = vmatpush.msk.msra.mxu0 %vm363_vm4, %v358_v3  ;;  %1145 = vmatpush.msk.msra.mxu1 %vm2393_vm2, %v357_v22  ;;  %vm2396_vm4 = vcmp.ge.s32.totalorder %v1834_v0, 1  ;;  %vm2398_vm2 = vmmov %vm2397_vm1  ;;  %vm2407_vm13 = vnez %v2366_v1 }
 0x12f   : > { %vm2402_vm5 = vmmov %vm2397_vm1 }
 0x130   : > { %1138 = vmatpush.msk.msra.mxu0 %vm2115_vm3, %v329_v38  ;;  %783 = vmatpush.msra.mxu1 %v328_v49  ;;  %vm2399_vm3 = vcmp.lt.s32.totalorder %v1661_v9, 112 }
 0x132   : > { %1139 = vmatpush.msk.msra.mxu0 %vm297_vm11, %v288_v13  ;;  %1146 = vmatpush.msk.msra.mxu1 %vm2396_vm4, %v287_v15  ;;  %vm2408_vm11 = vcmp.ge.s32.totalorder %v1661_v9, 16  ;;  %vm2409_vm4 = vmmov %vm2397_vm1 }
 0x133   : > { %1113 = vmatmul.msk.f32.vlgmr.msra.gmra.mxu0 %vm2397_vm1, %v1845_v8  ;;  %1115 = vmatmul.msk.f32.vlgmr.msra.gmra.mxu1 %vm2398_vm2, %v1845_v8  ;;  %vm933_vm2 = vcmask 654336  }
 0x134   : > { %1161 = vmatpush.msk.msrb.mxu0 %vm1862_vm12, %v1874_v16  ;;  %1169 = vmatpush.msk.msrb.mxu1 %vm1870_vm14, %v1876_v17  ;;  %vm2400_vm12 = vcmp.le.s32.totalorder %v1826_v61, 13  ;;  %vm2401_vm14 = vcmp.le.s32.totalorder %v1834_v0, 13  ;;  %v897_v36 = vpop.permute.xlu0 %896 }
 0x136   : > { %1162 = vmatpush.msk.msrb.mxu0 %vm2399_vm3, %v1911_v29  ;;  %1170 = vmatpush.msk.msrb.mxu1 %vm1853_vm9, %v1915_v30  ;;  %vm2403_vm9 = vmmov %vm2397_vm1  ;;  %vm931_vm3 = vcmask 523264  }
 0x138   : > { %1163 = vmatpush.msk.msrb.mxu0 %vm1905_vm10, %v1917_v34  ;;  %1171 = vmatpush.msk.msrb.mxu1 %vm1925_vm7, %v1919_v35  ;;  %vm2404_vm7 = vcmp.ge.s32.totalorder %v1826_v61, 2  ;;  %vm2405_vm10 = vcmp.ge.s32.totalorder %v1834_v0, 2 }
 0x13a   : > { %1164 = vmatpush.msk.msrb.mxu0 %vm2400_vm12, %v1945_v46  ;;  %1172 = vmatpush.msk.msrb.mxu1 %vm2401_vm14, %v1947_v47  ;;  %vm935_vm12 = vcmask 785408   ;;  %vm937_vm14 = vcmask 916480  }
 0x13b   : > { %1114 = vmatmul.msk.f32.gmra.mxu0 %vm2402_vm5, %v1887_v18  ;;  %1116 = vmatmul.msk.f32.gmra.mxu1 %vm2403_vm9, %v1887_v18 }
 0x13c   : > { %846 = vmatpush.msrb.mxu0 %v1635_v4  ;;  %868 = vmatpush.msrb.mxu1 %v1638_v5 }
 0x13e   : > { %1165 = vmatpush.msk.msrb.mxu0 %vm2404_vm7, %v1981_v56  ;;  %1173 = vmatpush.msk.msrb.mxu1 %vm2405_vm10, %v1984_v57 }
 0x140   : > { %1166 = vmatpush.msk.msrb.mxu0 %vm2406_vm8, %v1986_v60  ;;  %1174 = vmatpush.msk.msrb.mxu1 %vm2407_vm13, %v1988_v63 }
 0x141   : > { %v883_v34 = vpop.permute.xlu0 %882 }
 0x142   : > { %1167 = vmatpush.msk.msrb.mxu0 %vm2408_vm11, %v2019_v20  ;;  %1175 = vmatpush.msk.msrb.mxu1 %vm1960_vm6, %v2023_v21  ;;  %vm927_vm6 = vcmask 261120  }
 0x144   : > { %1168 = vmatpush.msk.msrb.mxu0 %vm2040_vm0, %v2067_v45  ;;  %1176 = vmatpush.msk.msrb.mxu1 %vm2054_vm15, %v2070_v51  ;;  %vm925_vm15 = vcmask 130048   ;;  %vm929_vm0 = vcmask 392192  }
 0x145   : > { %1121 = vmatmul.msk.f32.vlgmr.msrb.gmra.mxu0 %vm2409_vm4, %v1845_v8  ;;  %1123 = vmatmul.msk.f32.vlgmr.msrb.gmra.mxu1 %vm2397_vm1, %v1845_v8 }
 0x171   : > { %v2220_v5 = vpop.f32.mrf.mxu3 }
 0x172   : > { %v2218_v4 = vpop.f32.mrf.mxu2 }
 0x173   : > { %v887_v62 = vadd.f32 %v883_v34, %v2218_v4  ;;  %v888_v4 = vadd.f32 %v883_v34, %v2220_v5 }
 0x175   : > { %v891_v25 = vmax.f32 %v887_v62, 0.0 }
 0x17a   : > { %v811_v9 = vpop.f32.mrf.mxu2  ;;  %v833_v31 = vpop.f32.mrf.mxu3 }
 0x1a2   : > { %v854_v50 = vpop.f32.mrf.mxu2  ;;  %v876_v55 = vpop.f32.mrf.mxu3 }
 0x1a3   : > { %v899_v61 = vadd.f32 %v897_v36, %v854_v50  ;;  %v900_v0 = vadd.f32 %v897_v36, %v876_v55  ;;  %v892_v50 = vmax.f32 %v888_v4, 0.0 }
 0x1a5   : > { %v901_v10 = vmax.f32 %v899_v61, 0.0  ;;  %v2222_v11 = vmax.f32 %v900_v0, 0.0 }
 0x1a7   : > { %956 = vrot.lane.b32.xlu0 %v2222_v11, %s1414_s14  ;;  %913 = vrot.lane.b32.xlu2 %v901_v10, %s1414_s14 }
 0x1a8   : > { %904 = vrot.lane.b32.xlu1 %v901_v10, %s1405_s9 }
 0x1af   : > { %919 = vrot.lane.b32.xlu0 %v901_v10, %s1415_s13  ;;  %947 = vrot.lane.b32.xlu2 %v2222_v11, %s1405_s9 }
 0x1b0   : > { %916 = vrot.lane.b32.xlu1 %v901_v10, %s1416_s10  ;;  %v764_v8 = vpop.f32.mrf.mxu0  ;;  %v786_v14 = vpop.f32.mrf.mxu1 }
 0x1b1   : > { %v886_v54 = vadd.f32 %v883_v34, %v786_v14  ;;  %v885_v6 = vadd.f32 %v883_v34, %v764_v8 }
 0x1b3   : > { %v890_v12 = vmax.f32 %v886_v54, 0.0  ;;  %v889_v37 = vmax.f32 %v885_v6, 0.0 }
 0x1b7   : > { %953 = vrot.lane.b32.xlu0 %v2222_v11, %s1417_s0  ;;  %907 = vrot.lane.b32.xlu2 %v901_v10, %s1418_s22 }
 0x1b8   : > { %959 = vrot.lane.b32.xlu1 %v2222_v11, %s1416_s10  ;;  %v767_v16 = vpop.f32.mrf.mxu0  ;;  %v789_v17 = vpop.f32.mrf.mxu1 }
 0x1bf   : > { %962 = vrot.lane.b32.xlu2 %v2222_v11, %s1415_s13 }
 0x1c0   : > { %950 = vrot.lane.b32.xlu1 %v2222_v11, %s1418_s22 }
 0x1c2   : > { %v852_v18 = vpop.f32.mrf.mxu0  ;;  %v874_v28 = vpop.f32.mrf.mxu1 }
 0x1c7   : > { %922 = vrot.lane.b32.xlu2 %v901_v10, %s1400_s25 }
 0x1c8   : > { %910 = vrot.lane.b32.xlu1 %v901_v10, %s1417_s0 }
 0x1d0   : > { %965 = vrot.lane.b32.xlu1 %v2222_v11, %s1400_s25  ;;  %s2244_s25 = scalar_lea.vmem [#allocation8], %s1110_s8  ;;  %s1132_s8 = sshll.u32 %s1465_s19, 5 }
 0x1d1   : > { %s1002_s7 = scalar_lea.hbm %s2313_s4, %s1132_s8  ;;  %s1004_s20 = sshll.u32 %s2244_s25, 4  ;;  %s1005_s20 = int_to_ptr.vmem [resolvable:$true] %s1004_s20 }
 0x1d2   : > { %s1006_s19 = sshll.u32 %s1002_s7, 4  ;;  %s1007_s19 = int_to_ptr.hbm [resolvable:$true] %s1006_s19 }
 0x1d3   : > { %s1341_s26 = sshra.s32 %s1007_s19, 4  ;;  %s1342_s26 = int_to_ptr.hbm [resolvable:$true] %s1341_s26 }
 0x1d4   : > { %s1343_s30 = scalar_lea.hbm %s1342_s26, 32  ;;  %p1348_p10 = scmp.lt.s32.totalorder %s1342_s26, %s2313_s4 }
 0x1d5   : > { %p1344_p6 = scmp.ne.s32.totalorder %s1342_s26, %s1343_s30  ;;  %p1349_p2 = scmp.lt.s32.totalorder %s1347_s11, %s1343_s30 }
 0x1d7   : > { %p1345_p13 = pnand %p1344_p6, %p1494_p11  ;;  %p1350_p9 = por %p1349_p2, %p1348_p10 }
 0x1d9   : > { %p1346_p3 = pneg %p1345_p13 }
 0x1db   : > { %p1351_p0 = pnand %p1350_p9, %p1346_p3 }
 0x201   : > { %v914_v29 = vpop.permute.xlu2 %913 }
 0x209   : > { %v948_v30 = vpop.permute.xlu2 %947 }
 0x20a   : > { %v968_v41 = vsel %vm925_vm15, %v2222_v11, %v948_v30 }
 0x20b   : > { %v969_v26 = vsel %vm927_vm6, %v968_v41, %v948_v30 }
 0x211   : > { %v908_v35 = vpop.permute.xlu2 %907 }
 0x219   : > { %v957_v46 = vpop.permute.xlu0 %956  ;;  %v963_v47 = vpop.permute.xlu2 %962 }
 0x21a   : > { %v905_v39 = vpop.permute.xlu1 %904 }
 0x21b   : > { %v926_v58 = vsel %vm925_vm15, %v901_v10, %v905_v39 }
 0x21c   : > { %v928_v44 = vsel %vm927_vm6, %v926_v58, %v905_v39 }
 0x21d   : > { %v930_v52 = vsel %vm929_vm0, %v928_v44, %v908_v35 }
 0x21e   : > { %v932_v59 = vsel %vm931_vm3, %v930_v52, %v908_v35 }
 0x221   : > { %v920_v57 = vpop.permute.xlu0 %919  ;;  %v923_v63 = vpop.permute.xlu2 %922 }
 0x222   : > { %v917_v48 = vpop.permute.xlu1 %916 }
 0x223   : > { %v939_v53 = vsel %vm925_vm15, %v914_v29, %v917_v48 }
 0x224   : > { %v940_v56 = vsel %vm927_vm6, %v939_v53, %v917_v48 }
 0x225   : > { %v941_v60 = vsel %vm929_vm0, %v940_v56, %v920_v57 }
 0x226   : > { %v942_v1 = vsel %vm931_vm3, %v941_v60, %v920_v57 }
 0x227   : > { %v943_v7 = vsel %vm933_vm2, %v942_v1, %v923_v63 }
 0x228   : > { %v944_v13 = vsel %vm935_vm12, %v943_v7, %v923_v63 }
 0x229   : > { %v945_v15 = vsel %vm937_vm14, %v944_v13, %v901_v10  ;;  %v954_v45 = vpop.permute.xlu0 %953 }
 0x22a   : > { %v960_v20 = vpop.permute.xlu1 %959  ;;  %v983_v21 = vadd.f32 %v945_v15, %v890_v12 }
 0x22b   : > { %v975_v43 = vsel %vm925_vm15, %v957_v46, %v960_v20 }
 0x22c   : > { %987 = vst [vmem:[%s2244_s25 + $0x8] sm:$0xff] %v983_v21  ;;  %v976_v2 = vsel %vm927_vm6, %v975_v43, %v960_v20 }
 0x22d   : > { %v977_v49 = vsel %vm929_vm0, %v976_v2, %v963_v47 }
 0x22e   : > { %v978_v31 = vsel %vm931_vm3, %v977_v49, %v963_v47 }
 0x232   : > { %v951_v27 = vpop.permute.xlu1 %950 }
 0x233   : > { %v970_v40 = vsel %vm929_vm0, %v969_v26, %v951_v27 }
 0x234   : > { %v971_v51 = vsel %vm931_vm3, %v970_v40, %v951_v27 }
 0x235   : > { %v972_v19 = vsel %vm933_vm2, %v971_v51, %v954_v45 }
 0x236   : > { %v973_v24 = vsel %vm935_vm12, %v972_v19, %v954_v45 }
 0x237   : > { %v974_v23 = vsel %vm937_vm14, %v973_v24, %v957_v46 }
 0x238   : > { %v984_v42 = vadd.f32 %v974_v23, %v891_v25 }
 0x23a   : > { %v911_v32 = vpop.permute.xlu1 %910  ;;  %988 = vst [vmem:[%s2244_s25 + $0x10] sm:$0xff] %v984_v42 }
 0x23b   : > { %v934_v33 = vsel %vm933_vm2, %v932_v59, %v911_v32 }
 0x23c   : > { %v936_v3 = vsel %vm935_vm12, %v934_v33, %v911_v32 }
 0x23d   : > { %v938_v22 = vsel %vm937_vm14, %v936_v3, %v914_v29 }
 0x23e   : > { %v982_v38 = vadd.f32 %v938_v22, %v889_v37 }
 0x240   : > { %986 = vst [vmem:[%s2244_s25] sm:$0xff] %v982_v38 }
 0x242   : > { %v966_v9 = vpop.permute.xlu1 %965 }
 0x243   : > { %v979_v36 = vsel %vm933_vm2, %v978_v31, %v966_v9 }
 0x244   : > { %v980_v55 = vsel %vm935_vm12, %v979_v36, %v966_v9 }
 0x245   : > { %v981_v61 = vsel %vm937_vm14, %v980_v55, %v2222_v11 }
 0x246   : > { %v985_v5 = vadd.f32 %v981_v61, %v892_v50 }
 0x248   : > { %989 = vst [vmem:[%s2244_s25 + $0x18] sm:$0xff] %v985_v5 }
 0x249   : > { %1354 = shalt.err (!%p1351_p0)
}
 0x24a   : > { %1199 = dma.vmem_to_hbm [thread:$0]  (%p1494_p11), %s1005_s20, 512, %s1007_s19, %s991_s23  }
 0x24b PF: > { %s1018_s29 = sand.u32 1, %s1385_s15   ;;  %p2410_p1 = scmp.ge.s32.totalorder %s1397_s18, 2 }
 0x24c   : > { %s1019_s10 = scalar_lea.sflag [#allocation5], %s1018_s29 }
 0x24d   : > { %p1209_p4 = pnand %p2410_p1, %p1498_p12 }
 0x24f   : > { %p1210_p7 = pneg %p1209_p4 }
 0x251   : > { %1380 = dma.done.wait (%p1210_p7), %s1019_s10, 512  }
 0x252   : > { %1382 = vsyncadd (%p1210_p7), %s1019_s10, 4294966784  ;;  %p20_p5 = scmp.ge.s32.totalorder %s1469_s21, 4   ;;  %s2411_s15 = smov %s1389_s16 }
 0x253   : > { %s2412_s16 = smov %s1393_s17  ;;  %s2413_s17 = smov %s1481_s24 }
 0x254   : > { %s2414_s18 = smov %s1469_s21  ;;  %22 = sbr.rel (!%p20_p5) target bundleno = 9 (0x9), region = 94 }
 0x259   :  { %1025 = vsyncpa [#allocation4], 1 }
 0x25a   :  { %1027 = vsyncpa [#allocation4 + $0x1], 1 }
 0x25b   :  { %1028 = vsyncpa [#allocation7], 1 }
 0x25c   :  { %1030 = vsyncpa [#allocation7 + $0x1], 1 }
 0x25d   :  { %1031 = vsyncpa [#allocation5], 1 }
 0x25e   :  { %1033 = vsyncpa [#allocation5 + $0x1], 1 }

</bundles_post_ra>
